<compile_context>
chip_gen: v5e
topology: v5e:2x2
jax: 0.10.0
libtpu: 0.0.40
codegen_flags: <defaults>
</compile_context>

<pallas_src>
import jax
import jax.numpy as jnp
import numpy as np
from jax.experimental import pallas as pl
from jax.experimental.pallas import tpu as pltpu

B, S, E = 2, 8, 32     # batch, sequence length, embedding_dim
H = 32                 # LSTM_hidden_size
C1 = 16                # conv1_out
G = 2                  # conv2_out (attention glimpses)
KERNEL_SIZE = 1
PADDING = 0
DROPOUT = 0.0          # nn.Dropout at inference is the identity
LSTM_LAYER = 1

L = 4 * H              # 128: lane width of one replicated gate block

# Advisory cost estimate (tiny problem; helps XLA schedule around the call).
_FLOPS = 2 * (S * B) * E * (4 * L) + S * 2 * B * H * (4 * L) \
    + 2 * (S * B) * H * C1 + 2 * (S * B) * C1 * G            # ~1.07e6
_TRANSCENDENTALS = S * 5 * B * L + S * B * G + B * G          # ~10.3e3
_BYTES = 4 * (S * B * E + E * 4 * L + H * 4 * L + 4 * L
              + H * C1 + C1 + C1 * G + G + B * G * H)         # ~138 KB


def attq_kernel(q_ref, wx4_ref, wh4_ref, bx4_ref,
                w1_ref, b1_ref, w2_ref, b2_ref, out_ref):
    # ---- hoisted input projection: one [S*B, E] x [E, 4L] MXU dot, bias folded ----
    gx4 = jnp.dot(q_ref[...], wx4_ref[...],
                  preferred_element_type=jnp.float32) + bx4_ref[...]     # [S*B, 4L]

    wh4 = wh4_ref[...]                                                    # [H, 4L]

    # ---- serial LSTM recurrence (PyTorch gate order i, f, g, o) ----
    # Gates are kept 4x lane-replicated so every per-step op is a full-vreg
    # VPU/EUP op and gate extraction is a 128-lane-aligned (vreg) slice.
    h = jnp.zeros((B, H), jnp.float32)      # un-replicated hidden state
    c4 = jnp.zeros((B, L), jnp.float32)     # cell state, 4x lane-replicated
    hs = []
    for t in range(S):                      # static unroll; S is small & known
        pre = gx4[t * B:(t + 1) * B, :] + jnp.dot(
            h, wh4, preferred_element_type=jnp.float32)                   # [B, 4L]
        i4 = jax.nn.sigmoid(pre[:, 0 * L:1 * L])
        f4 = jax.nn.sigmoid(pre[:, 1 * L:2 * L])
        g4 = jnp.tanh(pre[:, 2 * L:3 * L])
        o4 = jax.nn.sigmoid(pre[:, 3 * L:4 * L])
        c4 = f4 * c4 + i4 * g4
        h4 = o4 * jnp.tanh(c4)                                            # [B, L]
        h = h4[:, :H]                        # offset-0 narrow (no lane rotate)
        hs.append(h)

    # ---- post-recurrence (one-shot, off the serial chain) ----
    # Dropout(p=0.0) -> identity (inference semantics).
    lstm2d = jnp.concatenate(hs, axis=0)     # [S*B, H], row index = t*B + b
    lstm_tbh = lstm2d.reshape(S, B, H)       # layout-trivial leading-dim split

    # conv1 (1x1 over channels) + ReLU, conv2 (1x1) as plain 2-D MXU dots.
    a1 = jnp.maximum(
        jnp.dot(lstm2d, w1_ref[...], preferred_element_type=jnp.float32)
        + b1_ref[...], 0.0)                                               # [S*B, C1]
    a2 = jnp.dot(a1, w2_ref[...],
                 preferred_element_type=jnp.float32) + b2_ref[...]        # [S*B, G]

    # softmax over the sequence axis (PyTorch dim=2 of [B, G, S]).
    a2_3 = a2.reshape(S, B, G)
    m = jnp.max(a2_3, axis=0, keepdims=True)
    p = jnp.exp(a2_3 - m)
    denom = jnp.sum(p, axis=0, keepdims=True)
    att = p * pl.reciprocal(denom, approx=True)                           # [S, B, G]

    # bmm([B,G,S], [B,S,H]) as per-glimpse broadcast-multiply-reduce on the VPU.
    parts = []
    for g in range(G):
        parts.append(jnp.sum(att[:, :, g:g + 1] * lstm_tbh, axis=0))      # [B, H]
    out_ref[...] = jnp.concatenate(parts, axis=1)                         # [B, G*H]


def pack_params(w_ih, w_hh, b_ih, b_hh, w1, b1, w2, b2):
    """One-time (parameter-load-time) packing: transpose + 4x lane-replicate."""
    b_sum = b_ih + b_hh
    wx_blocks, wh_blocks, b_blocks = [], [], []
    for gate in range(4):                       # PyTorch order: i, f, g, o
        sl = slice(gate * H, (gate + 1) * H)
        wx_blocks.append(jnp.tile(w_ih[sl, :].T, (1, 4)))    # [E, 128]
        wh_blocks.append(jnp.tile(w_hh[sl, :].T, (1, 4)))    # [H, 128]
        b_blocks.append(jnp.tile(b_sum[sl], (4,)))           # [128]
    wx4 = jnp.concatenate(wx_blocks, axis=1)                 # [E, 4L]
    wh4 = jnp.concatenate(wh_blocks, axis=1)                 # [H, 4L]
    bx4 = jnp.concatenate(b_blocks)[None, :]                 # [1, 4L]
    w1_t = w1[:, :, 0].T                                     # [H, C1]
    b1_2 = b1[None, :]                                       # [1, C1]
    w2_t = w2[:, :, 0].T                                     # [C1, G]
    b2_2 = b2[None, :]                                       # [1, G]
    return wx4, wh4, bx4, w1_t, b1_2, w2_t, b2_2


@jax.jit
def att_question_embedding(q, wx4, wh4, bx4, w1_t, b1_2, w2_t, b2_2):
    """Run the Pallas kernel. q: [B, S, E]; returns [B, G*H]."""
    # Time-major activation slab so per-step gate rows are contiguous sublanes.
    qt2d = jnp.transpose(q, (1, 0, 2)).reshape(S * B, E)     # row = t*B + b
    vmem = pl.BlockSpec(memory_space=pltpu.MemorySpace.VMEM)
    feat = pl.pallas_call(
        attq_kernel,
        out_shape=jax.ShapeDtypeStruct((B, G * H), jnp.float32),
        in_specs=[vmem] * 8,
        out_specs=vmem,
        cost_estimate=pl.CostEstimate(
            flops=_FLOPS, transcendentals=_TRANSCENDENTALS,
            bytes_accessed=_BYTES),
    )(qt2d, wx4, wh4, bx4, w1_t, b1_2, w2_t, b2_2)
    return feat                               # already == qtt_feature.view(B, -1)


def reference(q, w_ih, w_hh, b_ih, b_hh, w1, b1, w2, b2):
    """Pure-JAX reference mirroring the PyTorch forward (eval mode)."""
    h = jnp.zeros((B, H), jnp.float32)
    c = jnp.zeros((B, H), jnp.float32)
    outs = []
    for t in range(S):
        gates = q[:, t] @ w_ih.T + b_ih + h @ w_hh.T + b_hh
        i, f, g, o = jnp.split(gates, 4, axis=1)
        i, f, o = jax.nn.sigmoid(i), jax.nn.sigmoid(f), jax.nn.sigmoid(o)
        g = jnp.tanh(g)
        c = f * c + i * g
        h = o * jnp.tanh(c)
        outs.append(h)
    lstm = jnp.stack(outs, axis=1)                              # [B, S, H]
    a1 = jax.nn.relu(jnp.einsum('bsh,ch->bsc', lstm, w1[:, :, 0]) + b1)
    a2 = jnp.einsum('bsc,gc->bsg', a1, w2[:, :, 0]) + b2
    att = jax.nn.softmax(a2, axis=1)                            # softmax over seq
    feat = jnp.einsum('bsg,bsh->bgh', att, lstm)
    return feat.reshape(B, G * H)


if __name__ == "__main__":
    key = jax.random.PRNGKey(0)
    ks = jax.random.split(key, 9)
    bd = float(1.0 / np.sqrt(H))
    # Deterministic, PyTorch-shaped parameters (synthetic; no checkpoint load).
    w_ih = jax.random.uniform(ks[0], (4 * H, E), jnp.float32, -bd, bd)
    w_hh = jax.random.uniform(ks[1], (4 * H, H), jnp.float32, -bd, bd)
    b_ih = jax.random.uniform(ks[2], (4 * H,), jnp.float32, -bd, bd)
    b_hh = jax.random.uniform(ks[3], (4 * H,), jnp.float32, -bd, bd)
    w1 = jax.random.uniform(ks[4], (C1, H, KERNEL_SIZE), jnp.float32, -bd, bd)
    b1 = jax.random.uniform(ks[5], (C1,), jnp.float32, -bd, bd)
    w2 = jax.random.uniform(ks[6], (G, C1, KERNEL_SIZE), jnp.float32, -bd, bd)
    b2 = jax.random.uniform(ks[7], (G,), jnp.float32, -bd, bd)
    q = jax.random.normal(ks[8], (B, S, E), jnp.float32)

    packed = pack_params(w_ih, w_hh, b_ih, b_hh, w1, b1, w2, b2)  # once, at load
    out = att_question_embedding(q, *packed)
    out = jax.block_until_ready(out)
    ref = reference(q, w_ih, w_hh, b_ih, b_hh, w1, b1, w2, b2)
    assert out.shape == (B, H * G)
    # Tolerance covers the EUP approximate reciprocal used in the softmax.
    np.testing.assert_allclose(np.asarray(out), np.asarray(ref), atol=2e-3, rtol=2e-3)
    print("KERNEL_OK")
</pallas_src>

<mosaic_0001>
module attributes {stable_mosaic.version = 11 : i64} {
  func.func @attq_kernel(%arg0: memref<16x32xf32, #tpu.memory_space<vmem>>, %arg1: memref<32x512xf32, #tpu.memory_space<vmem>>, %arg2: memref<32x512xf32, #tpu.memory_space<vmem>>, %arg3: memref<1x512xf32, #tpu.memory_space<vmem>>, %arg4: memref<32x16xf32, #tpu.memory_space<vmem>>, %arg5: memref<1x16xf32, #tpu.memory_space<vmem>>, %arg6: memref<16x2xf32, #tpu.memory_space<vmem>>, %arg7: memref<1x2xf32, #tpu.memory_space<vmem>>, %arg8: memref<2x64xf32, #tpu.memory_space<vmem>>) attributes {dimension_semantics = [], scalar_prefetch = 0 : i64, scratch_operands = 0 : i64, tpu.core_type = #tpu.core_type<tc>} {
    %c0 = arith.constant 0 : index
    %c0_0 = arith.constant 0 : index
    %0 = vector.load %arg0[%c0, %c0_0] : memref<16x32xf32, #tpu.memory_space<vmem>>, vector<16x32xf32>
    %c0_1 = arith.constant 0 : index
    %c0_2 = arith.constant 0 : index
    %1 = vector.load %arg1[%c0_1, %c0_2] : memref<32x512xf32, #tpu.memory_space<vmem>>, vector<32x512xf32>
    %cst = arith.constant dense<0.000000e+00> : vector<16x512xf32>
    %2 = tpu.matmul %0, %1, %cst {dimension_numbers = #tpu.dot_dimension_numbers<[1], [0], [0], [1], [0, 0, 1, 1], [], []>} : vector<16x32xf32>, vector<32x512xf32>, vector<16x512xf32> -> vector<16x512xf32>
    %c0_3 = arith.constant 0 : index
    %c0_4 = arith.constant 0 : index
    %3 = vector.load %arg3[%c0_3, %c0_4] : memref<1x512xf32, #tpu.memory_space<vmem>>, vector<1x512xf32>
    %4 = vector.broadcast %3 : vector<1x512xf32> to vector<16x512xf32>
    %5 = arith.addf %2, %4 : vector<16x512xf32>
    %c0_5 = arith.constant 0 : index
    %c0_6 = arith.constant 0 : index
    %6 = vector.load %arg2[%c0_5, %c0_6] : memref<32x512xf32, #tpu.memory_space<vmem>>, vector<32x512xf32>
    %cst_7 = arith.constant 0.000000e+00 : f32
    %7 = vector.broadcast %cst_7 : f32 to vector<2x32xf32>
    %cst_8 = arith.constant 0.000000e+00 : f32
    %8 = vector.broadcast %cst_8 : f32 to vector<2x128xf32>
    %9 = vector.extract_strided_slice %5 {offsets = [0, 0], sizes = [2, 512], strides = [1, 1]} : vector<16x512xf32> to vector<2x512xf32>
    %cst_9 = arith.constant dense<0.000000e+00> : vector<2x512xf32>
    %10 = tpu.matmul %7, %6, %cst_9 {dimension_numbers = #tpu.dot_dimension_numbers<[1], [0], [0], [1], [0, 0, 1, 1], [], []>} : vector<2x32xf32>, vector<32x512xf32>, vector<2x512xf32> -> vector<2x512xf32>
    %11 = arith.addf %9, %10 : vector<2x512xf32>
    %12 = vector.extract_strided_slice %11 {offsets = [0, 0], sizes = [2, 128], strides = [1, 1]} : vector<2x512xf32> to vector<2x128xf32>
    %13 = arith.negf %12 : vector<2x128xf32>
    %14 = math.exp %13 : vector<2x128xf32>
    %cst_10 = arith.constant 1.000000e+00 : f32
    %15 = vector.broadcast %cst_10 : f32 to vector<2x128xf32>
    %16 = arith.addf %15, %14 : vector<2x128xf32>
    %17 = arith.divf %15, %16 : vector<2x128xf32>
    %18 = vector.extract_strided_slice %11 {offsets = [0, 128], sizes = [2, 128], strides = [1, 1]} : vector<2x512xf32> to vector<2x128xf32>
    %19 = arith.negf %18 : vector<2x128xf32>
    %20 = math.exp %19 : vector<2x128xf32>
    %cst_11 = arith.constant 1.000000e+00 : f32
    %21 = vector.broadcast %cst_11 : f32 to vector<2x128xf32>
    %22 = arith.addf %21, %20 : vector<2x128xf32>
    %23 = arith.divf %21, %22 : vector<2x128xf32>
    %24 = vector.extract_strided_slice %11 {offsets = [0, 256], sizes = [2, 128], strides = [1, 1]} : vector<2x512xf32> to vector<2x128xf32>
    %25 = math.tanh %24 : vector<2x128xf32>
    %26 = vector.extract_strided_slice %11 {offsets = [0, 384], sizes = [2, 128], strides = [1, 1]} : vector<2x512xf32> to vector<2x128xf32>
    %27 = arith.negf %26 : vector<2x128xf32>
    %28 = math.exp %27 : vector<2x128xf32>
    %cst_12 = arith.constant 1.000000e+00 : f32
    %29 = vector.broadcast %cst_12 : f32 to vector<2x128xf32>
    %30 = arith.addf %29, %28 : vector<2x128xf32>
    %31 = arith.divf %29, %30 : vector<2x128xf32>
    %32 = arith.mulf %23, %8 : vector<2x128xf32>
    %33 = arith.mulf %17, %25 : vector<2x128xf32>
    %34 = arith.addf %32, %33 : vector<2x128xf32>
    %35 = math.tanh %34 : vector<2x128xf32>
    %36 = arith.mulf %31, %35 : vector<2x128xf32>
    %37 = vector.extract_strided_slice %36 {offsets = [0, 0], sizes = [2, 32], strides = [1, 1]} : vector<2x128xf32> to vector<2x32xf32>
    %38 = vector.extract_strided_slice %5 {offsets = [2, 0], sizes = [2, 512], strides = [1, 1]} : vector<16x512xf32> to vector<2x512xf32>
    %cst_13 = arith.constant dense<0.000000e+00> : vector<2x512xf32>
    %39 = tpu.matmul %37, %6, %cst_13 {dimension_numbers = #tpu.dot_dimension_numbers<[1], [0], [0], [1], [0, 0, 1, 1], [], []>} : vector<2x32xf32>, vector<32x512xf32>, vector<2x512xf32> -> vector<2x512xf32>
    %40 = arith.addf %38, %39 : vector<2x512xf32>
    %41 = vector.extract_strided_slice %40 {offsets = [0, 0], sizes = [2, 128], strides = [1, 1]} : vector<2x512xf32> to vector<2x128xf32>
    %42 = arith.negf %41 : vector<2x128xf32>
    %43 = math.exp %42 : vector<2x128xf32>
    %cst_14 = arith.constant 1.000000e+00 : f32
    %44 = vector.broadcast %cst_14 : f32 to vector<2x128xf32>
    %45 = arith.addf %44, %43 : vector<2x128xf32>
    %46 = arith.divf %44, %45 : vector<2x128xf32>
    %47 = vector.extract_strided_slice %40 {offsets = [0, 128], sizes = [2, 128], strides = [1, 1]} : vector<2x512xf32> to vector<2x128xf32>
    %48 = arith.negf %47 : vector<2x128xf32>
    %49 = math.exp %48 : vector<2x128xf32>
    %cst_15 = arith.constant 1.000000e+00 : f32
    %50 = vector.broadcast %cst_15 : f32 to vector<2x128xf32>
    %51 = arith.addf %50, %49 : vector<2x128xf32>
    %52 = arith.divf %50, %51 : vector<2x128xf32>
    %53 = vector.extract_strided_slice %40 {offsets = [0, 256], sizes = [2, 128], strides = [1, 1]} : vector<2x512xf32> to vector<2x128xf32>
    %54 = math.tanh %53 : vector<2x128xf32>
    %55 = vector.extract_strided_slice %40 {offsets = [0, 384], sizes = [2, 128], strides = [1, 1]} : vector<2x512xf32> to vector<2x128xf32>
    %56 = arith.negf %55 : vector<2x128xf32>
    %57 = math.exp %56 : vector<2x128xf32>
    %cst_16 = arith.constant 1.000000e+00 : f32
    %58 = vector.broadcast %cst_16 : f32 to vector<2x128xf32>
    %59 = arith.addf %58, %57 : vector<2x128xf32>
    %60 = arith.divf %58, %59 : vector<2x128xf32>
    %61 = arith.mulf %52, %34 : vector<2x128xf32>
    %62 = arith.mulf %46, %54 : vector<2x128xf32>
    %63 = arith.addf %61, %62 : vector<2x128xf32>
    %64 = math.tanh %63 : vector<2x128xf32>
    %65 = arith.mulf %60, %64 : vector<2x128xf32>
    %66 = vector.extract_strided_slice %65 {offsets = [0, 0], sizes = [2, 32], strides = [1, 1]} : vector<2x128xf32> to vector<2x32xf32>
    %67 = vector.extract_strided_slice %5 {offsets = [4, 0], sizes = [2, 512], strides = [1, 1]} : vector<16x512xf32> to vector<2x512xf32>
    %cst_17 = arith.constant dense<0.000000e+00> : vector<2x512xf32>
    %68 = tpu.matmul %66, %6, %cst_17 {dimension_numbers = #tpu.dot_dimension_numbers<[1], [0], [0], [1], [0, 0, 1, 1], [], []>} : vector<2x32xf32>, vector<32x512xf32>, vector<2x512xf32> -> vector<2x512xf32>
    %69 = arith.addf %67, %68 : vector<2x512xf32>
    %70 = vector.extract_strided_slice %69 {offsets = [0, 0], sizes = [2, 128], strides = [1, 1]} : vector<2x512xf32> to vector<2x128xf32>
    %71 = arith.negf %70 : vector<2x128xf32>
    %72 = math.exp %71 : vector<2x128xf32>
    %cst_18 = arith.constant 1.000000e+00 : f32
    %73 = vector.broadcast %cst_18 : f32 to vector<2x128xf32>
    %74 = arith.addf %73, %72 : vector<2x128xf32>
    %75 = arith.divf %73, %74 : vector<2x128xf32>
    %76 = vector.extract_strided_slice %69 {offsets = [0, 128], sizes = [2, 128], strides = [1, 1]} : vector<2x512xf32> to vector<2x128xf32>
    %77 = arith.negf %76 : vector<2x128xf32>
    %78 = math.exp %77 : vector<2x128xf32>
    %cst_19 = arith.constant 1.000000e+00 : f32
    %79 = vector.broadcast %cst_19 : f32 to vector<2x128xf32>
    %80 = arith.addf %79, %78 : vector<2x128xf32>
    %81 = arith.divf %79, %80 : vector<2x128xf32>
    %82 = vector.extract_strided_slice %69 {offsets = [0, 256], sizes = [2, 128], strides = [1, 1]} : vector<2x512xf32> to vector<2x128xf32>
    %83 = math.tanh %82 : vector<2x128xf32>
    %84 = vector.extract_strided_slice %69 {offsets = [0, 384], sizes = [2, 128], strides = [1, 1]} : vector<2x512xf32> to vector<2x128xf32>
    %85 = arith.negf %84 : vector<2x128xf32>
    %86 = math.exp %85 : vector<2x128xf32>
    %cst_20 = arith.constant 1.000000e+00 : f32
    %87 = vector.broadcast %cst_20 : f32 to vector<2x128xf32>
    %88 = arith.addf %87, %86 : vector<2x128xf32>
    %89 = arith.divf %87, %88 : vector<2x128xf32>
    %90 = arith.mulf %81, %63 : vector<2x128xf32>
    %91 = arith.mulf %75, %83 : vector<2x128xf32>
    %92 = arith.addf %90, %91 : vector<2x128xf32>
    %93 = math.tanh %92 : vector<2x128xf32>
    %94 = arith.mulf %89, %93 : vector<2x128xf32>
    %95 = vector.extract_strided_slice %94 {offsets = [0, 0], sizes = [2, 32], strides = [1, 1]} : vector<2x128xf32> to vector<2x32xf32>
    %96 = vector.extract_strided_slice %5 {offsets = [6, 0], sizes = [2, 512], strides = [1, 1]} : vector<16x512xf32> to vector<2x512xf32>
    %cst_21 = arith.constant dense<0.000000e+00> : vector<2x512xf32>
    %97 = tpu.matmul %95, %6, %cst_21 {dimension_numbers = #tpu.dot_dimension_numbers<[1], [0], [0], [1], [0, 0, 1, 1], [], []>} : vector<2x32xf32>, vector<32x512xf32>, vector<2x512xf32> -> vector<2x512xf32>
    %98 = arith.addf %96, %97 : vector<2x512xf32>
    %99 = vector.extract_strided_slice %98 {offsets = [0, 0], sizes = [2, 128], strides = [1, 1]} : vector<2x512xf32> to vector<2x128xf32>
    %100 = arith.negf %99 : vector<2x128xf32>
    %101 = math.exp %100 : vector<2x128xf32>
    %cst_22 = arith.constant 1.000000e+00 : f32
    %102 = vector.broadcast %cst_22 : f32 to vector<2x128xf32>
    %103 = arith.addf %102, %101 : vector<2x128xf32>
    %104 = arith.divf %102, %103 : vector<2x128xf32>
    %105 = vector.extract_strided_slice %98 {offsets = [0, 128], sizes = [2, 128], strides = [1, 1]} : vector<2x512xf32> to vector<2x128xf32>
    %106 = arith.negf %105 : vector<2x128xf32>
    %107 = math.exp %106 : vector<2x128xf32>
    %cst_23 = arith.constant 1.000000e+00 : f32
    %108 = vector.broadcast %cst_23 : f32 to vector<2x128xf32>
    %109 = arith.addf %108, %107 : vector<2x128xf32>
    %110 = arith.divf %108, %109 : vector<2x128xf32>
    %111 = vector.extract_strided_slice %98 {offsets = [0, 256], sizes = [2, 128], strides = [1, 1]} : vector<2x512xf32> to vector<2x128xf32>
    %112 = math.tanh %111 : vector<2x128xf32>
    %113 = vector.extract_strided_slice %98 {offsets = [0, 384], sizes = [2, 128], strides = [1, 1]} : vector<2x512xf32> to vector<2x128xf32>
    %114 = arith.negf %113 : vector<2x128xf32>
    %115 = math.exp %114 : vector<2x128xf32>
    %cst_24 = arith.constant 1.000000e+00 : f32
    %116 = vector.broadcast %cst_24 : f32 to vector<2x128xf32>
    %117 = arith.addf %116, %115 : vector<2x128xf32>
    %118 = arith.divf %116, %117 : vector<2x128xf32>
    %119 = arith.mulf %110, %92 : vector<2x128xf32>
    %120 = arith.mulf %104, %112 : vector<2x128xf32>
    %121 = arith.addf %119, %120 : vector<2x128xf32>
    %122 = math.tanh %121 : vector<2x128xf32>
    %123 = arith.mulf %118, %122 : vector<2x128xf32>
    %124 = vector.extract_strided_slice %123 {offsets = [0, 0], sizes = [2, 32], strides = [1, 1]} : vector<2x128xf32> to vector<2x32xf32>
    %125 = vector.extract_strided_slice %5 {offsets = [8, 0], sizes = [2, 512], strides = [1, 1]} : vector<16x512xf32> to vector<2x512xf32>
    %cst_25 = arith.constant dense<0.000000e+00> : vector<2x512xf32>
    %126 = tpu.matmul %124, %6, %cst_25 {dimension_numbers = #tpu.dot_dimension_numbers<[1], [0], [0], [1], [0, 0, 1, 1], [], []>} : vector<2x32xf32>, vector<32x512xf32>, vector<2x512xf32> -> vector<2x512xf32>
    %127 = arith.addf %125, %126 : vector<2x512xf32>
    %128 = vector.extract_strided_slice %127 {offsets = [0, 0], sizes = [2, 128], strides = [1, 1]} : vector<2x512xf32> to vector<2x128xf32>
    %129 = arith.negf %128 : vector<2x128xf32>
    %130 = math.exp %129 : vector<2x128xf32>
    %cst_26 = arith.constant 1.000000e+00 : f32
    %131 = vector.broadcast %cst_26 : f32 to vector<2x128xf32>
    %132 = arith.addf %131, %130 : vector<2x128xf32>
    %133 = arith.divf %131, %132 : vector<2x128xf32>
    %134 = vector.extract_strided_slice %127 {offsets = [0, 128], sizes = [2, 128], strides = [1, 1]} : vector<2x512xf32> to vector<2x128xf32>
    %135 = arith.negf %134 : vector<2x128xf32>
    %136 = math.exp %135 : vector<2x128xf32>
    %cst_27 = arith.constant 1.000000e+00 : f32
    %137 = vector.broadcast %cst_27 : f32 to vector<2x128xf32>
    %138 = arith.addf %137, %136 : vector<2x128xf32>
    %139 = arith.divf %137, %138 : vector<2x128xf32>
    %140 = vector.extract_strided_slice %127 {offsets = [0, 256], sizes = [2, 128], strides = [1, 1]} : vector<2x512xf32> to vector<2x128xf32>
    %141 = math.tanh %140 : vector<2x128xf32>
    %142 = vector.extract_strided_slice %127 {offsets = [0, 384], sizes = [2, 128], strides = [1, 1]} : vector<2x512xf32> to vector<2x128xf32>
    %143 = arith.negf %142 : vector<2x128xf32>
    %144 = math.exp %143 : vector<2x128xf32>
    %cst_28 = arith.constant 1.000000e+00 : f32
    %145 = vector.broadcast %cst_28 : f32 to vector<2x128xf32>
    %146 = arith.addf %145, %144 : vector<2x128xf32>
    %147 = arith.divf %145, %146 : vector<2x128xf32>
    %148 = arith.mulf %139, %121 : vector<2x128xf32>
    %149 = arith.mulf %133, %141 : vector<2x128xf32>
    %150 = arith.addf %148, %149 : vector<2x128xf32>
    %151 = math.tanh %150 : vector<2x128xf32>
    %152 = arith.mulf %147, %151 : vector<2x128xf32>
    %153 = vector.extract_strided_slice %152 {offsets = [0, 0], sizes = [2, 32], strides = [1, 1]} : vector<2x128xf32> to vector<2x32xf32>
    %154 = vector.extract_strided_slice %5 {offsets = [10, 0], sizes = [2, 512], strides = [1, 1]} : vector<16x512xf32> to vector<2x512xf32>
    %cst_29 = arith.constant dense<0.000000e+00> : vector<2x512xf32>
    %155 = tpu.matmul %153, %6, %cst_29 {dimension_numbers = #tpu.dot_dimension_numbers<[1], [0], [0], [1], [0, 0, 1, 1], [], []>} : vector<2x32xf32>, vector<32x512xf32>, vector<2x512xf32> -> vector<2x512xf32>
    %156 = arith.addf %154, %155 : vector<2x512xf32>
    %157 = vector.extract_strided_slice %156 {offsets = [0, 0], sizes = [2, 128], strides = [1, 1]} : vector<2x512xf32> to vector<2x128xf32>
    %158 = arith.negf %157 : vector<2x128xf32>
    %159 = math.exp %158 : vector<2x128xf32>
    %cst_30 = arith.constant 1.000000e+00 : f32
    %160 = vector.broadcast %cst_30 : f32 to vector<2x128xf32>
    %161 = arith.addf %160, %159 : vector<2x128xf32>
    %162 = arith.divf %160, %161 : vector<2x128xf32>
    %163 = vector.extract_strided_slice %156 {offsets = [0, 128], sizes = [2, 128], strides = [1, 1]} : vector<2x512xf32> to vector<2x128xf32>
    %164 = arith.negf %163 : vector<2x128xf32>
    %165 = math.exp %164 : vector<2x128xf32>
    %cst_31 = arith.constant 1.000000e+00 : f32
    %166 = vector.broadcast %cst_31 : f32 to vector<2x128xf32>
    %167 = arith.addf %166, %165 : vector<2x128xf32>
    %168 = arith.divf %166, %167 : vector<2x128xf32>
    %169 = vector.extract_strided_slice %156 {offsets = [0, 256], sizes = [2, 128], strides = [1, 1]} : vector<2x512xf32> to vector<2x128xf32>
    %170 = math.tanh %169 : vector<2x128xf32>
    %171 = vector.extract_strided_slice %156 {offsets = [0, 384], sizes = [2, 128], strides = [1, 1]} : vector<2x512xf32> to vector<2x128xf32>
    %172 = arith.negf %171 : vector<2x128xf32>
    %173 = math.exp %172 : vector<2x128xf32>
    %cst_32 = arith.constant 1.000000e+00 : f32
    %174 = vector.broadcast %cst_32 : f32 to vector<2x128xf32>
    %175 = arith.addf %174, %173 : vector<2x128xf32>
    %176 = arith.divf %174, %175 : vector<2x128xf32>
    %177 = arith.mulf %168, %150 : vector<2x128xf32>
    %178 = arith.mulf %162, %170 : vector<2x128xf32>
    %179 = arith.addf %177, %178 : vector<2x128xf32>
    %180 = math.tanh %179 : vector<2x128xf32>
    %181 = arith.mulf %176, %180 : vector<2x128xf32>
    %182 = vector.extract_strided_slice %181 {offsets = [0, 0], sizes = [2, 32], strides = [1, 1]} : vector<2x128xf32> to vector<2x32xf32>
    %183 = vector.extract_strided_slice %5 {offsets = [12, 0], sizes = [2, 512], strides = [1, 1]} : vector<16x512xf32> to vector<2x512xf32>
    %cst_33 = arith.constant dense<0.000000e+00> : vector<2x512xf32>
    %184 = tpu.matmul %182, %6, %cst_33 {dimension_numbers = #tpu.dot_dimension_numbers<[1], [0], [0], [1], [0, 0, 1, 1], [], []>} : vector<2x32xf32>, vector<32x512xf32>, vector<2x512xf32> -> vector<2x512xf32>
    %185 = arith.addf %183, %184 : vector<2x512xf32>
    %186 = vector.extract_strided_slice %185 {offsets = [0, 0], sizes = [2, 128], strides = [1, 1]} : vector<2x512xf32> to vector<2x128xf32>
    %187 = arith.negf %186 : vector<2x128xf32>
    %188 = math.exp %187 : vector<2x128xf32>
    %cst_34 = arith.constant 1.000000e+00 : f32
    %189 = vector.broadcast %cst_34 : f32 to vector<2x128xf32>
    %190 = arith.addf %189, %188 : vector<2x128xf32>
    %191 = arith.divf %189, %190 : vector<2x128xf32>
    %192 = vector.extract_strided_slice %185 {offsets = [0, 128], sizes = [2, 128], strides = [1, 1]} : vector<2x512xf32> to vector<2x128xf32>
    %193 = arith.negf %192 : vector<2x128xf32>
    %194 = math.exp %193 : vector<2x128xf32>
    %cst_35 = arith.constant 1.000000e+00 : f32
    %195 = vector.broadcast %cst_35 : f32 to vector<2x128xf32>
    %196 = arith.addf %195, %194 : vector<2x128xf32>
    %197 = arith.divf %195, %196 : vector<2x128xf32>
    %198 = vector.extract_strided_slice %185 {offsets = [0, 256], sizes = [2, 128], strides = [1, 1]} : vector<2x512xf32> to vector<2x128xf32>
    %199 = math.tanh %198 : vector<2x128xf32>
    %200 = vector.extract_strided_slice %185 {offsets = [0, 384], sizes = [2, 128], strides = [1, 1]} : vector<2x512xf32> to vector<2x128xf32>
    %201 = arith.negf %200 : vector<2x128xf32>
    %202 = math.exp %201 : vector<2x128xf32>
    %cst_36 = arith.constant 1.000000e+00 : f32
    %203 = vector.broadcast %cst_36 : f32 to vector<2x128xf32>
    %204 = arith.addf %203, %202 : vector<2x128xf32>
    %205 = arith.divf %203, %204 : vector<2x128xf32>
    %206 = arith.mulf %197, %179 : vector<2x128xf32>
    %207 = arith.mulf %191, %199 : vector<2x128xf32>
    %208 = arith.addf %206, %207 : vector<2x128xf32>
    %209 = math.tanh %208 : vector<2x128xf32>
    %210 = arith.mulf %205, %209 : vector<2x128xf32>
    %211 = vector.extract_strided_slice %210 {offsets = [0, 0], sizes = [2, 32], strides = [1, 1]} : vector<2x128xf32> to vector<2x32xf32>
    %212 = vector.extract_strided_slice %5 {offsets = [14, 0], sizes = [2, 512], strides = [1, 1]} : vector<16x512xf32> to vector<2x512xf32>
    %cst_37 = arith.constant dense<0.000000e+00> : vector<2x512xf32>
    %213 = tpu.matmul %211, %6, %cst_37 {dimension_numbers = #tpu.dot_dimension_numbers<[1], [0], [0], [1], [0, 0, 1, 1], [], []>} : vector<2x32xf32>, vector<32x512xf32>, vector<2x512xf32> -> vector<2x512xf32>
    %214 = arith.addf %212, %213 : vector<2x512xf32>
    %215 = vector.extract_strided_slice %214 {offsets = [0, 0], sizes = [2, 128], strides = [1, 1]} : vector<2x512xf32> to vector<2x128xf32>
    %216 = arith.negf %215 : vector<2x128xf32>
    %217 = math.exp %216 : vector<2x128xf32>
    %cst_38 = arith.constant 1.000000e+00 : f32
    %218 = vector.broadcast %cst_38 : f32 to vector<2x128xf32>
    %219 = arith.addf %218, %217 : vector<2x128xf32>
    %220 = arith.divf %218, %219 : vector<2x128xf32>
    %221 = vector.extract_strided_slice %214 {offsets = [0, 128], sizes = [2, 128], strides = [1, 1]} : vector<2x512xf32> to vector<2x128xf32>
    %222 = arith.negf %221 : vector<2x128xf32>
    %223 = math.exp %222 : vector<2x128xf32>
    %cst_39 = arith.constant 1.000000e+00 : f32
    %224 = vector.broadcast %cst_39 : f32 to vector<2x128xf32>
    %225 = arith.addf %224, %223 : vector<2x128xf32>
    %226 = arith.divf %224, %225 : vector<2x128xf32>
    %227 = vector.extract_strided_slice %214 {offsets = [0, 256], sizes = [2, 128], strides = [1, 1]} : vector<2x512xf32> to vector<2x128xf32>
    %228 = math.tanh %227 : vector<2x128xf32>
    %229 = vector.extract_strided_slice %214 {offsets = [0, 384], sizes = [2, 128], strides = [1, 1]} : vector<2x512xf32> to vector<2x128xf32>
    %230 = arith.negf %229 : vector<2x128xf32>
    %231 = math.exp %230 : vector<2x128xf32>
    %cst_40 = arith.constant 1.000000e+00 : f32
    %232 = vector.broadcast %cst_40 : f32 to vector<2x128xf32>
    %233 = arith.addf %232, %231 : vector<2x128xf32>
    %234 = arith.divf %232, %233 : vector<2x128xf32>
    %235 = arith.mulf %226, %208 : vector<2x128xf32>
    %236 = arith.mulf %220, %228 : vector<2x128xf32>
    %237 = arith.addf %235, %236 : vector<2x128xf32>
    %238 = math.tanh %237 : vector<2x128xf32>
    %239 = arith.mulf %234, %238 : vector<2x128xf32>
    %240 = vector.extract_strided_slice %239 {offsets = [0, 0], sizes = [2, 32], strides = [1, 1]} : vector<2x128xf32> to vector<2x32xf32>
    %241 = tpu.concatenate %37, %66, %95, %124, %153, %182, %211, %240 in 0 : vector<2x32xf32>, vector<2x32xf32>, vector<2x32xf32>, vector<2x32xf32>, vector<2x32xf32>, vector<2x32xf32>, vector<2x32xf32>, vector<2x32xf32> -> vector<16x32xf32>
    %242 = vector.shape_cast %241 : vector<16x32xf32> to vector<8x2x32xf32>
    %c0_41 = arith.constant 0 : index
    %c0_42 = arith.constant 0 : index
    %243 = vector.load %arg4[%c0_41, %c0_42] : memref<32x16xf32, #tpu.memory_space<vmem>>, vector<32x16xf32>
    %cst_43 = arith.constant dense<0.000000e+00> : vector<16x16xf32>
    %244 = tpu.matmul %241, %243, %cst_43 {dimension_numbers = #tpu.dot_dimension_numbers<[1], [0], [0], [1], [0, 0, 1, 1], [], []>} : vector<16x32xf32>, vector<32x16xf32>, vector<16x16xf32> -> vector<16x16xf32>
    %c0_44 = arith.constant 0 : index
    %c0_45 = arith.constant 0 : index
    %245 = vector.load %arg5[%c0_44, %c0_45] : memref<1x16xf32, #tpu.memory_space<vmem>>, vector<1x16xf32>
    %246 = vector.broadcast %245 : vector<1x16xf32> to vector<16x16xf32>
    %247 = arith.addf %244, %246 : vector<16x16xf32>
    %cst_46 = arith.constant 0.000000e+00 : f32
    %248 = vector.broadcast %cst_46 : f32 to vector<16x16xf32>
    %249 = arith.maximumf %247, %248 : vector<16x16xf32>
    %c0_47 = arith.constant 0 : index
    %c0_48 = arith.constant 0 : index
    %250 = vector.load %arg6[%c0_47, %c0_48] : memref<16x2xf32, #tpu.memory_space<vmem>>, vector<16x2xf32>
    %cst_49 = arith.constant dense<0.000000e+00> : vector<16x2xf32>
    %251 = tpu.matmul %249, %250, %cst_49 {dimension_numbers = #tpu.dot_dimension_numbers<[1], [0], [0], [1], [0, 0, 1, 1], [], []>} : vector<16x16xf32>, vector<16x2xf32>, vector<16x2xf32> -> vector<16x2xf32>
    %c0_50 = arith.constant 0 : index
    %c0_51 = arith.constant 0 : index
    %252 = vector.load %arg7[%c0_50, %c0_51] : memref<1x2xf32, #tpu.memory_space<vmem>>, vector<1x2xf32>
    %253 = vector.broadcast %252 : vector<1x2xf32> to vector<16x2xf32>
    %254 = arith.addf %251, %253 : vector<16x2xf32>
    %255 = vector.shape_cast %254 : vector<16x2xf32> to vector<8x2x2xf32>
    %cst_52 = arith.constant dense<0xFF800000> : vector<2x2xf32>
    %256 = vector.multi_reduction <maximumf>, %255, %cst_52 [0] : vector<8x2x2xf32> to vector<2x2xf32>
    %257 = vector.shape_cast %256 : vector<2x2xf32> to vector<1x2x2xf32>
    %258 = vector.broadcast %257 : vector<1x2x2xf32> to vector<8x2x2xf32>
    %259 = arith.subf %255, %258 : vector<8x2x2xf32>
    %260 = math.exp %259 : vector<8x2x2xf32>
    %cst_53 = arith.constant dense<0.000000e+00> : vector<2x2xf32>
    %261 = vector.multi_reduction <add>, %260, %cst_53 [0] : vector<8x2x2xf32> to vector<2x2xf32>
    %262 = vector.shape_cast %261 : vector<2x2xf32> to vector<1x2x2xf32>
    %263 = tpu.reciprocal %262 {approx = true} : vector<1x2x2xf32> -> vector<1x2x2xf32>
    %264 = vector.broadcast %263 : vector<1x2x2xf32> to vector<8x2x2xf32>
    %265 = arith.mulf %260, %264 : vector<8x2x2xf32>
    %266 = vector.extract_strided_slice %265 {offsets = [0, 0, 0], sizes = [8, 2, 1], strides = [1, 1, 1]} : vector<8x2x2xf32> to vector<8x2x1xf32>
    %267 = vector.broadcast %266 : vector<8x2x1xf32> to vector<8x2x32xf32>
    %268 = arith.mulf %267, %242 : vector<8x2x32xf32>
    %cst_54 = arith.constant dense<0.000000e+00> : vector<2x32xf32>
    %269 = vector.multi_reduction <add>, %268, %cst_54 [0] : vector<8x2x32xf32> to vector<2x32xf32>
    %270 = vector.extract_strided_slice %265 {offsets = [0, 0, 1], sizes = [8, 2, 1], strides = [1, 1, 1]} : vector<8x2x2xf32> to vector<8x2x1xf32>
    %271 = vector.broadcast %270 : vector<8x2x1xf32> to vector<8x2x32xf32>
    %272 = arith.mulf %271, %242 : vector<8x2x32xf32>
    %cst_55 = arith.constant dense<0.000000e+00> : vector<2x32xf32>
    %273 = vector.multi_reduction <add>, %272, %cst_55 [0] : vector<8x2x32xf32> to vector<2x32xf32>
    %274 = tpu.concatenate %269, %273 in 1 : vector<2x32xf32>, vector<2x32xf32> -> vector<2x64xf32>
    %c0_56 = arith.constant 0 : index
    %c0_57 = arith.constant 0 : index
    %275 = vector.load %arg8[%c0_56, %c0_57] : memref<2x64xf32, #tpu.memory_space<vmem>>, vector<2x64xf32>
    tpu.vector_store %arg8[%c0_56, %c0_57], %274 {strides = array<i32>} : memref<2x64xf32, #tpu.memory_space<vmem>>, vector<2x64xf32>,
    return
  }
}

</mosaic_0001>

<bundles_post_ra>
// kernel: att_question_embedding.1
= control target key start
LH: loop header
LB: loop body
LE: loop exit
PB: predicated region body
PF: predicated region fallthrough
CT: control target
= control target key end

     0   :  { %13 = vsyncpa [#allocation3], 0  ;;  %s2689_s0 = inlined_call_operand.vmem [shape: f32[16,32], index: 0, kind: input, shape index: {}]   ;;  %s2690_s1 = inlined_call_operand.hbm [shape: f32[32,512], index: 1, kind: input, shape index: {}]   ;;  %s2691_s2 = inlined_call_operand.hbm [shape: f32[32,512], index: 2, kind: input, shape index: {}]   ;;  %s2692_s3 = inlined_call_operand.vmem [shape: f32[1,512], index: 3, kind: input, shape index: {}]   ;;  %s2693_s4 = inlined_call_operand.vmem [shape: f32[32,16], index: 4, kind: input, shape index: {}]   ;;  %s2694_s5 = inlined_call_operand.vmem [shape: f32[1,16], index: 5, kind: input, shape index: {}]   ;;  %s2695_s6 = inlined_call_operand.vmem [shape: f32[16,2], index: 6, kind: input, shape index: {}]   ;;  %s2696_s7 = inlined_call_operand.vmem [shape: f32[1,2], index: 7, kind: input, shape index: {}]   ;;  %s2697_s8 = inlined_call_operand.hbm [shape: f32[2,64], index: 8, kind: output, shape index: {}]  }
   0x1   :  { %14 = vsyncpa [#allocation6], 0 }
   0x2   :  { %15 = vsyncpa [#allocation4], 0  ;;  %s22_s29 = sshll.u32 %s2690_s1, 4  ;;  %s2215_s30 = smov [#allocation2]   ;;  %s23_s29 = int_to_ptr.hbm [resolvable:$true] %s22_s29 }
   0x3   :  { %s24_s9 = sshll.u32 %s2215_s30, 4  ;;  %s35_s12 = sshll.u32 %s2691_s2, 4  ;;  %s25_s9 = int_to_ptr.vmem [resolvable:$true] %s24_s9  ;;  %s36_s12 = int_to_ptr.hbm [resolvable:$true] %s35_s12 }
   0x4   :  { %s2216_s13 = smov 512   ;;  %s2217_s14 = smov 32  }
   0x5   :  { %30 = dma.hbm_to_vmem [thread:$0]  %s23_s29, 2048, %s25_s9, [#allocation3], %s2216_s13, %s2216_s13, %s2217_s14  }
   0x6   :  { %s2218_s15 = smov [#allocation5]  }
   0x7   :  { %s37_s16 = sshll.u32 %s2218_s15, 4  ;;  %s38_s16 = int_to_ptr.vmem [resolvable:$true] %s37_s16 }
   0x8   :  { %43 = dma.hbm_to_vmem [thread:$0]  %s36_s12, 2048, %s38_s16, [#allocation6], %s2216_s13, %s2216_s13, %s2217_s14  }
   0x9   :  { %2209 = dma.done.wait [#allocation3], 2048  }
   0xa   :  { %2210 = vsyncadd [#allocation3], 4294965248 }
   0xb   :  { %2211 = dma.done.wait [#allocation6], 2048  }
   0xc   :  { %2212 = vsyncadd [#allocation6], 4294965248  ;;  %v76_v0 = vld [vmem:[#allocation2 + $0x60] sm:$0xff]  ;;  %v77_v1 = vld [vmem:[#allocation2 + $0x68] sm:$0xff]  ;;  %vm90_vm0 = vcmask 261120   ;;  %v2219_v28 = vmov 0.0  }
   0xd   :  { %v72_v2 = vld [vmem:[#allocation2 + $0x40] sm:$0xff]  ;;  %109 = vmatpush.msra.mxu0 %v76_v0  ;;  %1949 = vmatpush.msra.mxu2 %v76_v0  ;;  %v73_v3 = vld [vmem:[#allocation2 + $0x48] sm:$0xff]  ;;  %v79_v10 = vld [vmem:[#allocation2 + $0x78] sm:$0xff]  ;;  %s1874_s13 = sshll.u32 %s2697_s8, 4  ;;  %s1875_s13 = int_to_ptr.hbm [resolvable:$true] %s1874_s13 }
   0xe   :  { %132 = vmatpush.msra.mxu1 %v77_v1  ;;  %1953 = vmatpush.msra.mxu3 %v77_v1  ;;  %v68_v4 = vld [vmem:[#allocation2 + $0x20] sm:$0xff]  ;;  %v69_v5 = vld [vmem:[#allocation2 + $0x28] sm:$0xff]  ;;  %v78_v11 = vld [vmem:[#allocation2 + $0x70] sm:$0xff] }
   0xf   :  { %110 = vmatpush.msra.mxu0 %v72_v2  ;;  %1950 = vmatpush.msra.mxu2 %v72_v2  ;;  %v64_v6 = vld [vmem:[#allocation2] sm:$0xff]  ;;  %v65_v7 = vld [vmem:[#allocation2 + $0x8] sm:$0xff]  ;;  %v75_v14 = vld [vmem:[#allocation2 + $0x58] sm:$0xff] }
  0x10   :  { %133 = vmatpush.msra.mxu1 %v73_v3  ;;  %1954 = vmatpush.msra.mxu3 %v73_v3  ;;  %v62_v8 = vld [vmem:[%s2689_s0] sm:$0xff]  ;;  %v2283_v9 = vld [vmem:[%s2689_s0 + $0x8] sm:$0xff]  ;;  %v74_v15 = vld [vmem:[#allocation2 + $0x50] sm:$0xff] }
  0x11   :  { %111 = vmatpush.msra.mxu0 %v68_v4  ;;  %1951 = vmatpush.msra.mxu2 %v68_v4  ;;  %v2288_v12 = vld [vmem:[#allocation5 + $0x60] sm:$0xff]  ;;  %v2290_v13 = vld [vmem:[#allocation5 + $0x68] sm:$0xff]  ;;  %v71_v18 = vld [vmem:[#allocation2 + $0x38] sm:$0xff] }
  0x12   :  { %134 = vmatpush.msra.mxu1 %v69_v5  ;;  %1955 = vmatpush.msra.mxu3 %v69_v5  ;;  %v2295_v16 = vld [vmem:[#allocation5 + $0x40] sm:$0xff]  ;;  %v2297_v17 = vld [vmem:[#allocation5 + $0x48] sm:$0xff]  ;;  %v70_v19 = vld [vmem:[#allocation2 + $0x30] sm:$0xff] }
  0x13   :  { %112 = vmatpush.msra.mxu0 %v64_v6  ;;  %1952 = vmatpush.msra.mxu2 %v64_v6  ;;  %v2301_v20 = vld [vmem:[#allocation5 + $0x20] sm:$0xff]  ;;  %v2303_v21 = vld [vmem:[#allocation5 + $0x28] sm:$0xff]  ;;  %v67_v22 = vld [vmem:[#allocation2 + $0x18] sm:$0xff] }
  0x14   :  { %135 = vmatpush.msra.mxu1 %v65_v7  ;;  %1956 = vmatpush.msra.mxu3 %v65_v7  ;;  %v66_v23 = vld [vmem:[#allocation2 + $0x10] sm:$0xff]  ;;  %v2307_v24 = vld [vmem:[#allocation5] sm:$0xff]  ;;  %v2309_v25 = vld [vmem:[#allocation5 + $0x8] sm:$0xff] }
  0x15   :  { %1885 = vmatmul.msk.f32.vlgmr.msra.gmra.mxu0 %vm90_vm0, %v62_v8  ;;  %1886 = vmatmul.msk.f32.vlgmr.msra.gmra.mxu2 %vm90_vm0, %v2283_v9  ;;  %v2315_v26 = vld [vmem:[#allocation5 + $0x78] sm:$0xff]  ;;  %v2317_v27 = vld [vmem:[#allocation5 + $0x70] sm:$0xff]  ;;  %v80_v35 = vld [vmem:[%s2692_s3] sm:$0xf] }
  0x16   :  { %1887 = vmatmul.msk.f32.vlgmr.msra.gmra.mxu1 %vm90_vm0, %v62_v8  ;;  %1888 = vmatmul.msk.f32.vlgmr.msra.gmra.mxu3 %vm90_vm0, %v2283_v9  ;;  %v2321_v29 = vld [vmem:[#allocation5 + $0x58] sm:$0xff]  ;;  %v2323_v30 = vld [vmem:[#allocation5 + $0x50] sm:$0xff]  ;;  %v82_v38 = vperm.slane %v80_v35, 0  ;;  %v83_v39 = vperm.slane %v80_v35, 1  ;;  %v84_v57 = vperm.slane %v80_v35, 2  ;;  %v85_v58 = vperm.slane %v80_v35, 3 }
  0x17   :  { %178 = vmatpush.msrb.mxu3 %v79_v10  ;;  %155 = vmatpush.msrb.mxu2 %v78_v11  ;;  %v2327_v31 = vld [vmem:[#allocation5 + $0x38] sm:$0xff]  ;;  %v2329_v32 = vld [vmem:[#allocation5 + $0x30] sm:$0xff] }
  0x18   :  { %220 = vmatpush.msrb.mxu0 %v2288_v12  ;;  %240 = vmatpush.msrb.mxu1 %v2290_v13  ;;  %v2338_v33 = vld [vmem:[#allocation5 + $0x18] sm:$0xff]  ;;  %v2341_v34 = vld [vmem:[#allocation5 + $0x10] sm:$0xff] }
  0x19   :  { %179 = vmatpush.msrb.mxu3 %v75_v14  ;;  %156 = vmatpush.msrb.mxu2 %v74_v15 }
  0x1a   :  { %221 = vmatpush.msrb.mxu0 %v2295_v16  ;;  %241 = vmatpush.msrb.mxu1 %v2297_v17 }
  0x1b   :  { %180 = vmatpush.msrb.mxu3 %v71_v18  ;;  %157 = vmatpush.msrb.mxu2 %v70_v19 }
  0x1c   :  { %222 = vmatpush.msrb.mxu0 %v2301_v20  ;;  %242 = vmatpush.msrb.mxu1 %v2303_v21 }
  0x1d   :  { %181 = vmatpush.msrb.mxu3 %v67_v22  ;;  %158 = vmatpush.msrb.mxu2 %v66_v23 }
  0x1e   :  { %223 = vmatpush.msrb.mxu0 %v2307_v24  ;;  %243 = vmatpush.msrb.mxu1 %v2309_v25 }
  0x1f   :  { %1889 = vmatmul.msk.f32.vlgmr.msrb.gmra.mxu2 %vm90_vm0, %v62_v8  ;;  %1891 = vmatmul.msk.f32.vlgmr.msrb.gmra.mxu3 %vm90_vm0, %v62_v8 }
  0x20   :  { %224 = vmatmul.f32.vlgmr.msrb.gmra.mxu0 %v2219_v28  ;;  %244 = vmatmul.f32.vlgmr.msrb.gmra.mxu1 %v2219_v28 }
  0x21   :  { %280 = vmatpush.msra.mxu3 %v2315_v26  ;;  %260 = vmatpush.msra.mxu2 %v2317_v27 }
  0x22   :  { %370 = vmatpush.msra.mxu0 %v2288_v12  ;;  %390 = vmatpush.msra.mxu1 %v2290_v13 }
  0x23   :  { %281 = vmatpush.msra.mxu3 %v2321_v29  ;;  %261 = vmatpush.msra.mxu2 %v2323_v30 }
  0x24   :  { %371 = vmatpush.msra.mxu0 %v2295_v16  ;;  %391 = vmatpush.msra.mxu1 %v2297_v17 }
  0x25   :  { %282 = vmatpush.msra.mxu3 %v2327_v31  ;;  %262 = vmatpush.msra.mxu2 %v2329_v32 }
  0x26   :  { %372 = vmatpush.msra.mxu0 %v2301_v20  ;;  %392 = vmatpush.msra.mxu1 %v2303_v21 }
  0x27   :  { %1890 = vmatmul.msk.f32.gmra.mxu2 %vm90_vm0, %v2283_v9  ;;  %1892 = vmatmul.msk.f32.gmra.mxu3 %vm90_vm0, %v2283_v9 }
  0x28   :  { %283 = vmatpush.msra.mxu3 %v2338_v33  ;;  %263 = vmatpush.msra.mxu2 %v2341_v34 }
  0x29   :  { %373 = vmatpush.msra.mxu0 %v2307_v24  ;;  %393 = vmatpush.msra.mxu1 %v2309_v25 }
  0x2a   :  { %410 = vmatpush.msrb.mxu2 %v2317_v27  ;;  %430 = vmatpush.msrb.mxu3 %v2315_v26 }
  0x2b   :  { %536 = vmatpush.msrb.mxu0 %v2288_v12  ;;  %556 = vmatpush.msrb.mxu1 %v2290_v13 }
  0x2c   :  { %411 = vmatpush.msrb.mxu2 %v2323_v30  ;;  %431 = vmatpush.msrb.mxu3 %v2321_v29 }
  0x2d   :  { %537 = vmatpush.msrb.mxu0 %v2295_v16  ;;  %557 = vmatpush.msrb.mxu1 %v2297_v17 }
  0x2e   :  { %412 = vmatpush.msrb.mxu2 %v2329_v32  ;;  %432 = vmatpush.msrb.mxu3 %v2327_v31 }
  0x2f   :  { %264 = vmatmul.f32.vlgmr.msra.gmra.mxu2 %v2219_v28  ;;  %284 = vmatmul.f32.vlgmr.msra.gmra.mxu3 %v2219_v28 }
  0x30   :  { %413 = vmatpush.msrb.mxu2 %v2341_v34  ;;  %433 = vmatpush.msrb.mxu3 %v2338_v33 }
  0x31   :  { %538 = vmatpush.msrb.mxu0 %v2301_v20  ;;  %558 = vmatpush.msrb.mxu1 %v2303_v21 }
  0x32   :  { %576 = vmatpush.msra.mxu2 %v2317_v27  ;;  %596 = vmatpush.msra.mxu3 %v2315_v26 }
  0x33   :  { %539 = vmatpush.msrb.mxu0 %v2307_v24  ;;  %559 = vmatpush.msrb.mxu1 %v2309_v25 }
  0x34   :  { %577 = vmatpush.msra.mxu2 %v2323_v30  ;;  %597 = vmatpush.msra.mxu3 %v2321_v29 }
  0x36   :  { %578 = vmatpush.msra.mxu2 %v2329_v32  ;;  %598 = vmatpush.msra.mxu3 %v2327_v31 }
  0x38   :  { %579 = vmatpush.msra.mxu2 %v2341_v34  ;;  %599 = vmatpush.msra.mxu3 %v2338_v33 }
  0x92   :  { %v114_v36 = vpop.f32.mrf.mxu0 }
  0x93   :  { %v137_v37 = vpop.f32.mrf.mxu1  ;;  %v2382_v43 = vadd.f32 %v114_v36, %v82_v38 }
  0x94   :  { %v2384_v44 = vadd.f32 %v137_v37, %v83_v39 }
  0x98   :  { %v117_v40 = vpop.f32.mrf.mxu2 }
  0x99   :  { %v2380_v41 = vadd.f32 %v117_v40, %v82_v38  ;;  %v140_v42 = vpop.f32.mrf.mxu3 }
  0x9a   :  { %v2386_v45 = vadd.f32 %v140_v42, %v83_v39 }
  0x9d   :  { %v225_v46 = vpop.f32.mrf.mxu0  ;;  %v245_v47 = vpop.f32.mrf.mxu1 }
  0x9e   :  { %v288_v48 = vadd.f32 %v225_v46, %v2382_v43  ;;  %v289_v49 = vadd.f32 %v245_v47, %v2384_v44 }
  0xa0   :  { %v1893_v50 = vmul.f32 -1.442695, %v288_v48  ;;  %v1894_v51 = vmul.f32 -1.442695, %v289_v49 }
  0xa2   :  { %1975 = vpow2.f32 %v1893_v50  ;;  %v160_v52 = vpop.f32.mrf.mxu2  ;;  %v183_v53 = vpop.f32.mrf.mxu3 }
  0xa3   :  { %1977 = vpow2.f32 %v1894_v51  ;;  %v2394_v1 = vadd.f32 %v183_v53, %v85_v58  ;;  %v2396_v7 = vadd.f32 %v160_v52, %v84_v57 }
  0xa8   :  { %v1976_v54 = vpop.eup %1975 }
  0xa9   :  { %v1978_v55 = vpop.eup %1977  ;;  %v295_v56 = vadd.f32 1.0, %v1976_v54 }
  0xaa   :  { %v314_v59 = vadd.f32 1.0, %v1978_v55  ;;  %v163_v60 = vpop.f32.mrf.mxu2  ;;  %v186_v61 = vpop.f32.mrf.mxu3 }
  0xab   :  { %1979 = vrcp.f32 %v295_v56  ;;  %v2390_v62 = vadd.f32 %v163_v60, %v84_v57  ;;  %v2392_v63 = vadd.f32 %v186_v61, %v85_v58  ;;  %vm301_vm2 = vweird.f32 %v295_v56 }
  0xac   :  { %1981 = vrcp.f32 %v314_v59  ;;  %v326_v22 = vand.u32 2147483648, %v314_v59  ;;  %v307_v23 = vand.u32 2147483648, %v295_v56  ;;  %vm320_vm4 = vweird.f32 %v314_v59 }
  0xad   :  { %v305_v35 = vand.u32 2147483647, %v295_v56  ;;  %v324_v36 = vand.u32 2147483647, %v314_v59 }
  0xae   :  { %v327_v40 = vor.u32 1.1754944e-38, %v326_v22  ;;  %v308_v42 = vor.u32 1.1754944e-38, %v307_v23 }
  0xaf   :  { %vm306_vm7 = vcmp.eq.f32.partialorder %v305_v35, 8.507059e+37  ;;  %vm325_vm8 = vcmp.eq.f32.partialorder %v324_v36, 8.507059e+37 }
  0xb1   :  { %v1980_v0 = vpop.eup %1979 }
  0xb2   :  { %v1982_v2 = vpop.eup %1981  ;;  %v297_v3 = vmul.f32 %v1980_v0, %v295_v56  ;;  %v265_v4 = vpop.f32.mrf.mxu2  ;;  %vm302_vm1 = vweird.f32 %v1980_v0 }
  0xb3   :  { %v285_v5 = vpop.f32.mrf.mxu3  ;;  %v316_v6 = vmul.f32 %v1982_v2, %v314_v59  ;;  %v290_v11 = vadd.f32 %v265_v4, %v2396_v7  ;;  %vm321_vm3 = vweird.f32 %v1982_v2  ;;  %vm303_vm5 = vmor %vm301_vm2, %vm302_vm1 }
  0xb4   :  { %v291_v8 = vadd.f32 %v285_v5, %v2394_v1  ;;  %v298_v9 = vsub.f32 1.0, %v297_v3  ;;  %vm322_vm6 = vmor %vm320_vm4, %vm321_vm3 }
  0xb5   :  { %v317_v10 = vsub.f32 1.0, %v316_v6 }
  0xb6   :  { %v1895_v14 = vmul.f32 -1.442695, %v291_v8  ;;  %v299_v15 = vmul.f32 %v1980_v0, %v298_v9 }
  0xb7   :  { %v318_v18 = vmul.f32 %v1982_v2, %v317_v10 }
  0xb8   :  { %1983 = vpow2.f32 %v1895_v14  ;;  %v300_v19 = vadd.f32 %v1980_v0, %v299_v15 }
  0xb9   :  { %v319_v28 = vadd.f32 %v1982_v2, %v318_v18  ;;  %1985 = vtanh.f32 %v290_v11 }
  0xba   :  { %v304_v37 = vsel %vm303_vm5, %v1980_v0, %v300_v19 }
  0xbb   :  { %v323_v38 = vsel %vm322_vm6, %v1982_v2, %v319_v28  ;;  %v309_v48 = vsel %vm306_vm7, %v308_v42, %v304_v37 }
  0xbc   :  { %v328_v49 = vsel %vm325_vm8, %v327_v40, %v323_v38 }
  0xbd   :  { %v350_v50 = vmul.f32 0.0, %v328_v49 }
  0xbe   :  { %v1984_v39 = vpop.eup %1983 }
  0xbf   :  { %v334_v46 = vadd.f32 1.0, %v1984_v39  ;;  %v1986_v47 = vpop.eup %1985 }
  0xc0   :  { %v351_v51 = vmul.f32 %v1986_v47, %v309_v48 }
  0xc1   :  { %1987 = vrcp.f32 %v334_v46  ;;  %v346_v56 = vand.u32 2147483648, %v334_v46  ;;  %v344_v58 = vand.u32 2147483647, %v334_v46  ;;  %vm340_vm10 = vweird.f32 %v334_v46 }
  0xc2   :  { %v2400_v53 = vadd.f32 %v351_v51, %v350_v50 }
  0xc3   :  { %v347_v60 = vor.u32 1.1754944e-38, %v346_v56  ;;  %vm345_vm12 = vcmp.eq.f32.partialorder %v344_v58, 8.507059e+37 }
  0xc4   :  { %1989 = vtanh.f32 %v2400_v53 }
  0xc7   :  { %v1988_v52 = vpop.eup %1987 }
  0xc8   :  { %v336_v54 = vmul.f32 %v1988_v52, %v334_v46  ;;  %vm341_vm9 = vweird.f32 %v1988_v52 }
  0xc9   :  { %vm342_vm11 = vmor %vm340_vm10, %vm341_vm9 }
  0xca   :  { %v337_v55 = vsub.f32 1.0, %v336_v54  ;;  %v1990_v0 = vpop.eup %1989 }
  0xcc   :  { %v338_v57 = vmul.f32 %v1988_v52, %v337_v55 }
  0xce   :  { %v339_v59 = vadd.f32 %v1988_v52, %v338_v57 }
  0xd0   :  { %v343_v61 = vsel %vm342_vm11, %v1988_v52, %v339_v59 }
  0xd1   :  { %v348_v2 = vsel %vm345_vm12, %v347_v60, %v343_v61 }
  0xd2   :  { %v2403_v3 = vmul.f32 %v1990_v0, %v348_v2 }
  0xd4   :  { %1896 = vmatmul.msk.f32.vlgmr.msra.gmra.mxu0 %vm90_vm0, %v2403_v3  ;;  %1897 = vmatmul.msk.f32.vlgmr.msra.gmra.mxu1 %vm90_vm0, %v2403_v3 }
  0xd5   :  { %1898 = vmatmul.msk.f32.vlgmr.msrb.gmra.mxu2 %vm90_vm0, %v2403_v3  ;;  %1899 = vmatmul.msk.f32.vlgmr.msrb.gmra.mxu3 %vm90_vm0, %v2403_v3 }
  0xd6   :  { %702 = vmatpush.msra.mxu0 %v2288_v12  ;;  %722 = vmatpush.msra.mxu1 %v2290_v13 }
  0xd7   :  { %742 = vmatpush.msrb.mxu2 %v2317_v27  ;;  %762 = vmatpush.msrb.mxu3 %v2315_v26 }
  0xd8   :  { %703 = vmatpush.msra.mxu0 %v2295_v16  ;;  %723 = vmatpush.msra.mxu1 %v2297_v17 }
  0xd9   :  { %743 = vmatpush.msrb.mxu2 %v2323_v30  ;;  %763 = vmatpush.msrb.mxu3 %v2321_v29 }
  0xda   :  { %704 = vmatpush.msra.mxu0 %v2301_v20  ;;  %724 = vmatpush.msra.mxu1 %v2303_v21 }
  0xdb   :  { %744 = vmatpush.msrb.mxu2 %v2329_v32  ;;  %764 = vmatpush.msrb.mxu3 %v2327_v31 }
  0xdc   :  { %705 = vmatpush.msra.mxu0 %v2307_v24  ;;  %725 = vmatpush.msra.mxu1 %v2309_v25 }
  0xdd   :  { %745 = vmatpush.msrb.mxu2 %v2341_v34  ;;  %765 = vmatpush.msrb.mxu3 %v2338_v33 }
 0x151   :  { %v375_v4 = vpop.f32.mrf.mxu0  ;;  %v395_v5 = vpop.f32.mrf.mxu1 }
 0x152   :  { %v442_v6 = vrot.slane %v375_v4, 6  ;;  %v443_v8 = vrot.slane %v395_v5, 6  ;;  %v513_v4 = vrot.slane %v2400_v53, 6 }
 0x154   :  { %v450_v9 = vadd.f32 %v442_v6, %v2382_v43  ;;  %v451_v10 = vadd.f32 %v443_v8, %v2384_v44 }
 0x156   :  { %v1900_v11 = vmul.f32 -1.442695, %v450_v9  ;;  %v1901_v14 = vmul.f32 -1.442695, %v451_v10 }
 0x158   :  { %1991 = vpow2.f32 %v1900_v11  ;;  %v435_v15 = vpop.f32.mrf.mxu3  ;;  %v415_v37 = vpop.f32.mrf.mxu2 }
 0x159   :  { %1993 = vpow2.f32 %v1901_v14  ;;  %v445_v18 = vrot.slane %v435_v15, 6  ;;  %v444_v38 = vrot.slane %v415_v37, 6 }
 0x15b   :  { %v453_v19 = vadd.f32 %v445_v18, %v2394_v1  ;;  %v452_v46 = vadd.f32 %v444_v38, %v2396_v7 }
 0x15d   :  { %v1902_v22 = vmul.f32 -1.442695, %v453_v19 }
 0x15e   :  { %v1992_v23 = vpop.eup %1991 }
 0x15f   :  { %v1994_v28 = vpop.eup %1993  ;;  %v457_v35 = vadd.f32 1.0, %v1992_v23  ;;  %1995 = vpow2.f32 %v1902_v22 }
 0x160   :  { %v476_v36 = vadd.f32 1.0, %v1994_v28 }
 0x161   :  { %1997 = vrcp.f32 %v457_v35  ;;  %v469_v52 = vand.u32 2147483648, %v457_v35  ;;  %v467_v56 = vand.u32 2147483647, %v457_v35  ;;  %vm463_vm15 = vweird.f32 %v457_v35 }
 0x162   :  { %1999 = vrcp.f32 %v476_v36  ;;  %v488_v54 = vand.u32 2147483648, %v476_v36  ;;  %v486_v58 = vand.u32 2147483647, %v476_v36  ;;  %vm482_vm1 = vweird.f32 %v476_v36 }
 0x163   :  { %v470_v61 = vor.u32 1.1754944e-38, %v469_v52  ;;  %vm468_vm4 = vcmp.eq.f32.partialorder %v467_v56, 8.507059e+37 }
 0x164   :  { %v489_v5 = vor.u32 1.1754944e-38, %v488_v54  ;;  %vm487_vm5 = vcmp.eq.f32.partialorder %v486_v58, 8.507059e+37 }
 0x165   :  { %v1996_v39 = vpop.eup %1995 }
 0x166   :  { %v496_v40 = vadd.f32 1.0, %v1996_v39 }
 0x167   :  { %v1998_v42 = vpop.eup %1997 }
 0x168   :  { %v2000_v47 = vpop.eup %1999  ;;  %v459_v48 = vmul.f32 %v1998_v42, %v457_v35  ;;  %2001 = vrcp.f32 %v496_v40  ;;  %vm464_vm13 = vweird.f32 %v1998_v42  ;;  %v508_v53 = vand.u32 2147483648, %v496_v40 }
 0x169   :  { %v478_v49 = vmul.f32 %v2000_v47, %v476_v36  ;;  %2003 = vtanh.f32 %v452_v46  ;;  %vm483_vm14 = vweird.f32 %v2000_v47  ;;  %vm465_vm2 = vmor %vm463_vm15, %vm464_vm13  ;;  %vm502_vm7 = vweird.f32 %v496_v40 }
 0x16a   :  { %v460_v50 = vsub.f32 1.0, %v459_v48  ;;  %vm484_vm3 = vmor %vm482_vm1, %vm483_vm14  ;;  %v506_v28 = vand.u32 2147483647, %v496_v40  ;;  %v509_v36 = vor.u32 1.1754944e-38, %v508_v53 }
 0x16b   :  { %v479_v51 = vsub.f32 1.0, %v478_v49 }
 0x16c   :  { %v461_v55 = vmul.f32 %v1998_v42, %v460_v50  ;;  %vm507_vm9 = vcmp.eq.f32.partialorder %v506_v28, 8.507059e+37 }
 0x16d   :  { %v480_v57 = vmul.f32 %v2000_v47, %v479_v51 }
 0x16e   :  { %v2002_v59 = vpop.eup %2001  ;;  %v462_v60 = vadd.f32 %v1998_v42, %v461_v55 }
 0x16f   :  { %v481_v0 = vadd.f32 %v2000_v47, %v480_v57  ;;  %v498_v2 = vmul.f32 %v2002_v59, %v496_v40  ;;  %v2004_v8 = vpop.eup %2003  ;;  %vm503_vm6 = vweird.f32 %v2002_v59 }
 0x170   :  { %v466_v6 = vsel %vm465_vm2, %v1998_v42, %v462_v60  ;;  %vm504_vm8 = vmor %vm502_vm7, %vm503_vm6  ;;  %vm1503_vm7 = vcmask 1041408  }
 0x171   :  { %v471_v9 = vsel %vm468_vm4, %v470_v61, %v466_v6  ;;  %v485_v10 = vsel %vm484_vm3, %v2000_v47, %v481_v0  ;;  %v499_v11 = vsub.f32 1.0, %v498_v2 }
 0x172   :  { %v490_v14 = vsel %vm487_vm5, %v489_v5, %v485_v10  ;;  %v516_v15 = vmul.f32 %v2004_v8, %v471_v9 }
 0x173   :  { %v515_v18 = vmul.f32 %v513_v4, %v490_v14  ;;  %v500_v19 = vmul.f32 %v2002_v59, %v499_v11 }
 0x175   :  { %v2434_v22 = vadd.f32 %v516_v15, %v515_v18  ;;  %v501_v23 = vadd.f32 %v2002_v59, %v500_v19 }
 0x177   :  { %2005 = vtanh.f32 %v2434_v22  ;;  %v505_v35 = vsel %vm504_vm8, %v2002_v59, %v501_v23  ;;  %vm1505_vm8 = vcmask 1043456  }
 0x178   :  { %v510_v38 = vsel %vm507_vm9, %v509_v36, %v505_v35 }
 0x17d   :  { %v2006_v37 = vpop.eup %2005 }
 0x17e   :  { %v2437_v39 = vmul.f32 %v2006_v37, %v510_v38 }
 0x180   :  { %v521_v42 = vrot.slane %v2437_v39, 2 }
 0x182   :  { %1903 = vmatmul.msk.f32.vlgmr.msrb.gmra.mxu0 %vm90_vm0, %v521_v42  ;;  %1904 = vmatmul.msk.f32.vlgmr.msrb.gmra.mxu1 %vm90_vm0, %v521_v42 }
 0x183   :  { %1905 = vmatmul.msk.f32.vlgmr.msra.gmra.mxu2 %vm90_vm0, %v521_v42  ;;  %1906 = vmatmul.msk.f32.vlgmr.msra.gmra.mxu3 %vm90_vm0, %v521_v42 }
 0x184   :  { %868 = vmatpush.msrb.mxu0 %v2288_v12  ;;  %888 = vmatpush.msrb.mxu1 %v2290_v13 }
 0x185   :  { %908 = vmatpush.msra.mxu2 %v2317_v27  ;;  %928 = vmatpush.msra.mxu3 %v2315_v26 }
 0x186   :  { %869 = vmatpush.msrb.mxu0 %v2295_v16  ;;  %889 = vmatpush.msrb.mxu1 %v2297_v17 }
 0x187   :  { %909 = vmatpush.msra.mxu2 %v2323_v30  ;;  %929 = vmatpush.msra.mxu3 %v2321_v29 }
 0x188   :  { %870 = vmatpush.msrb.mxu0 %v2301_v20  ;;  %890 = vmatpush.msrb.mxu1 %v2303_v21 }
 0x189   :  { %910 = vmatpush.msra.mxu2 %v2329_v32  ;;  %930 = vmatpush.msra.mxu3 %v2327_v31 }
 0x18a   :  { %871 = vmatpush.msrb.mxu0 %v2307_v24  ;;  %891 = vmatpush.msrb.mxu1 %v2309_v25 }
 0x18b   :  { %911 = vmatpush.msra.mxu2 %v2341_v34  ;;  %931 = vmatpush.msra.mxu3 %v2338_v33 }
 0x1ff   :  { %v541_v40 = vpop.f32.mrf.mxu0  ;;  %v561_v46 = vpop.f32.mrf.mxu1 }
 0x200   :  { %v608_v47 = vrot.slane %v541_v40, 4  ;;  %v609_v48 = vrot.slane %v561_v46, 4  ;;  %v679_v46 = vrot.slane %v2434_v22, 6 }
 0x202   :  { %v616_v49 = vadd.f32 %v608_v47, %v2382_v43  ;;  %v617_v50 = vadd.f32 %v609_v48, %v2384_v44 }
 0x204   :  { %v1907_v51 = vmul.f32 -1.442695, %v616_v49  ;;  %v1908_v52 = vmul.f32 -1.442695, %v617_v50 }
 0x206   :  { %2007 = vpow2.f32 %v1907_v51  ;;  %v601_v54 = vpop.f32.mrf.mxu3  ;;  %v581_v0 = vpop.f32.mrf.mxu2 }
 0x207   :  { %2009 = vpow2.f32 %v1908_v52  ;;  %v611_v55 = vrot.slane %v601_v54, 4  ;;  %v610_v2 = vrot.slane %v581_v0, 4 }
 0x209   :  { %v619_v56 = vadd.f32 %v611_v55, %v2394_v1  ;;  %v618_v8 = vadd.f32 %v610_v2, %v2396_v7 }
 0x20b   :  { %v1909_v57 = vmul.f32 -1.442695, %v619_v56 }
 0x20c   :  { %v2008_v58 = vpop.eup %2007 }
 0x20d   :  { %v2010_v59 = vpop.eup %2009  ;;  %v623_v60 = vadd.f32 1.0, %v2008_v58  ;;  %2011 = vpow2.f32 %v1909_v57 }
 0x20e   :  { %v642_v61 = vadd.f32 1.0, %v2010_v59 }
 0x20f   :  { %2013 = vrcp.f32 %v623_v60  ;;  %v635_v18 = vand.u32 2147483648, %v623_v60  ;;  %v633_v53 = vand.u32 2147483647, %v623_v60  ;;  %vm629_vm12 = vweird.f32 %v623_v60 }
 0x210   :  { %2015 = vrcp.f32 %v642_v61  ;;  %v654_v19 = vand.u32 2147483648, %v642_v61  ;;  %v652_v35 = vand.u32 2147483647, %v642_v61  ;;  %vm648_vm13 = vweird.f32 %v642_v61 }
 0x211   :  { %v636_v38 = vor.u32 1.1754944e-38, %v635_v18  ;;  %vm634_vm1 = vcmp.eq.f32.partialorder %v633_v53, 8.507059e+37 }
 0x212   :  { %v655_v47 = vor.u32 1.1754944e-38, %v654_v19  ;;  %vm653_vm2 = vcmp.eq.f32.partialorder %v652_v35, 8.507059e+37 }
 0x213   :  { %v2012_v4 = vpop.eup %2011 }
 0x214   :  { %v662_v5 = vadd.f32 1.0, %v2012_v4 }
 0x215   :  { %v2014_v6 = vpop.eup %2013 }
 0x216   :  { %v2016_v9 = vpop.eup %2015  ;;  %v625_v10 = vmul.f32 %v2014_v6, %v623_v60  ;;  %2017 = vrcp.f32 %v662_v5  ;;  %vm630_vm10 = vweird.f32 %v2014_v6  ;;  %v674_v22 = vand.u32 2147483648, %v662_v5 }
 0x217   :  { %v644_v11 = vmul.f32 %v2016_v9, %v642_v61  ;;  %2019 = vtanh.f32 %v618_v8  ;;  %vm649_vm11 = vweird.f32 %v2016_v9  ;;  %vm631_vm14 = vmor %vm629_vm12, %vm630_vm10  ;;  %vm668_vm4 = vweird.f32 %v662_v5 }
 0x218   :  { %v626_v14 = vsub.f32 1.0, %v625_v10  ;;  %vm650_vm15 = vmor %vm648_vm13, %vm649_vm11  ;;  %v672_v60 = vand.u32 2147483647, %v662_v5  ;;  %v675_v0 = vor.u32 1.1754944e-38, %v674_v22  ;;  %v1504_v8 = vsel %vm1503_vm7, %v2403_v3, %v2437_v39 }
 0x219   :  { %v645_v15 = vsub.f32 1.0, %v644_v11 }
 0x21a   :  { %v627_v23 = vmul.f32 %v2014_v6, %v626_v14  ;;  %vm673_vm6 = vcmp.eq.f32.partialorder %v672_v60, 8.507059e+37 }
 0x21b   :  { %v646_v28 = vmul.f32 %v2016_v9, %v645_v15 }
 0x21c   :  { %v2018_v36 = vpop.eup %2017  ;;  %v628_v37 = vadd.f32 %v2014_v6, %v627_v23 }
 0x21d   :  { %v647_v42 = vadd.f32 %v2016_v9, %v646_v28  ;;  %v664_v40 = vmul.f32 %v2018_v36, %v662_v5  ;;  %v2020_v49 = vpop.eup %2019  ;;  %vm669_vm3 = vweird.f32 %v2018_v36 }
 0x21e   :  { %v632_v48 = vsel %vm631_vm14, %v2014_v6, %v628_v37  ;;  %vm670_vm5 = vmor %vm668_vm4, %vm669_vm3 }
 0x21f   :  { %v637_v50 = vsel %vm634_vm1, %v636_v38, %v632_v48  ;;  %v651_v51 = vsel %vm650_vm15, %v2016_v9, %v647_v42  ;;  %v665_v52 = vsub.f32 1.0, %v664_v40 }
 0x220   :  { %v656_v54 = vsel %vm653_vm2, %v655_v47, %v651_v51  ;;  %v682_v55 = vmul.f32 %v2020_v49, %v637_v50 }
 0x221   :  { %v681_v56 = vmul.f32 %v679_v46, %v656_v54  ;;  %v666_v57 = vmul.f32 %v2018_v36, %v665_v52 }
 0x223   :  { %v2465_v58 = vadd.f32 %v682_v55, %v681_v56  ;;  %v667_v59 = vadd.f32 %v2018_v36, %v666_v57 }
 0x225   :  { %2021 = vtanh.f32 %v2465_v58  ;;  %v671_v61 = vsel %vm670_vm5, %v2018_v36, %v667_v59 }
 0x226   :  { %v676_v4 = vsel %vm673_vm6, %v675_v0, %v671_v61  ;;  %vm1507_vm6 = vcmask 1045504  }
 0x22b   :  { %v2022_v2 = vpop.eup %2021 }
 0x22c   :  { %v685_v6 = vmul.f32 %v2022_v2, %v676_v4  ;;  %v845_v4 = vrot.slane %v2465_v58, 6 }
 0x22e   :  { %v687_v9 = vrot.slane %v685_v6, 4  ;;  %v2472_v10 = vsel %vm1505_vm8, %v1504_v8, %v685_v6 }
 0x230   :  { %1910 = vmatmul.msk.f32.vlgmr.msra.gmra.mxu0 %vm90_vm0, %v687_v9  ;;  %1911 = vmatmul.msk.f32.vlgmr.msra.gmra.mxu1 %vm90_vm0, %v687_v9 }
 0x231   :  { %1912 = vmatmul.msk.f32.vlgmr.msrb.gmra.mxu2 %vm90_vm0, %v687_v9  ;;  %1913 = vmatmul.msk.f32.vlgmr.msrb.gmra.mxu3 %vm90_vm0, %v687_v9 }
 0x232   :  { %1021 = vmatpush.msra.mxu0 %v2288_v12  ;;  %1041 = vmatpush.msra.mxu1 %v2290_v13 }
 0x233   :  { %1061 = vmatpush.msrb.mxu2 %v2317_v27  ;;  %1081 = vmatpush.msrb.mxu3 %v2315_v26 }
 0x234   :  { %1022 = vmatpush.msra.mxu0 %v2295_v16  ;;  %1042 = vmatpush.msra.mxu1 %v2297_v17 }
 0x235   :  { %1062 = vmatpush.msrb.mxu2 %v2323_v30  ;;  %1082 = vmatpush.msrb.mxu3 %v2321_v29 }
 0x236   :  { %1023 = vmatpush.msra.mxu0 %v2301_v20  ;;  %1043 = vmatpush.msra.mxu1 %v2303_v21 }
 0x237   :  { %1063 = vmatpush.msrb.mxu2 %v2329_v32  ;;  %1083 = vmatpush.msrb.mxu3 %v2327_v31 }
 0x238   :  { %1024 = vmatpush.msra.mxu0 %v2307_v24  ;;  %1044 = vmatpush.msra.mxu1 %v2309_v25 }
 0x239   :  { %1064 = vmatpush.msrb.mxu2 %v2341_v34  ;;  %1084 = vmatpush.msrb.mxu3 %v2338_v33 }
 0x2ad   :  { %v707_v3 = vpop.f32.mrf.mxu0  ;;  %v727_v39 = vpop.f32.mrf.mxu1 }
 0x2ae   :  { %v774_v5 = vrot.slane %v707_v3, 2  ;;  %v775_v11 = vrot.slane %v727_v39, 2 }
 0x2b0   :  { %v782_v14 = vadd.f32 %v774_v5, %v2382_v43  ;;  %v783_v15 = vadd.f32 %v775_v11, %v2384_v44 }
 0x2b2   :  { %v1914_v18 = vmul.f32 -1.442695, %v782_v14  ;;  %v1915_v19 = vmul.f32 -1.442695, %v783_v15 }
 0x2b4   :  { %2023 = vpow2.f32 %v1914_v18  ;;  %v767_v23 = vpop.f32.mrf.mxu3  ;;  %v747_v40 = vpop.f32.mrf.mxu2 }
 0x2b5   :  { %2025 = vpow2.f32 %v1915_v19  ;;  %v777_v53 = vrot.slane %v767_v23, 2  ;;  %v776_v43 = vrot.slane %v747_v40, 2 }
 0x2b7   :  { %v785_v28 = vadd.f32 %v777_v53, %v2394_v1  ;;  %v784_v48 = vadd.f32 %v776_v43, %v2396_v7 }
 0x2b9   :  { %v1916_v35 = vmul.f32 -1.442695, %v785_v28 }
 0x2ba   :  { %v2024_v36 = vpop.eup %2023 }
 0x2bb   :  { %v2026_v37 = vpop.eup %2025  ;;  %v789_v38 = vadd.f32 1.0, %v2024_v36  ;;  %2027 = vpow2.f32 %v1916_v35 }
 0x2bc   :  { %v808_v42 = vadd.f32 1.0, %v2026_v37 }
 0x2bd   :  { %2029 = vrcp.f32 %v789_v38  ;;  %v801_v54 = vand.u32 2147483648, %v789_v38  ;;  %v799_v57 = vand.u32 2147483647, %v789_v38  ;;  %vm795_vm11 = vweird.f32 %v789_v38 }
 0x2be   :  { %2031 = vrcp.f32 %v808_v42  ;;  %v820_v55 = vand.u32 2147483648, %v808_v42  ;;  %v818_v22 = vand.u32 2147483647, %v808_v42  ;;  %vm814_vm12 = vweird.f32 %v808_v42 }
 0x2bf   :  { %v802_v7 = vor.u32 1.1754944e-38, %v801_v54  ;;  %vm800_vm15 = vcmp.eq.f32.partialorder %v799_v57, 8.507059e+37 }
 0x2c0   :  { %v821_v6 = vor.u32 1.1754944e-38, %v820_v55  ;;  %vm819_vm1 = vcmp.eq.f32.partialorder %v818_v22, 8.507059e+37 }
 0x2c1   :  { %v2028_v46 = vpop.eup %2027 }
 0x2c2   :  { %v828_v44 = vadd.f32 1.0, %v2028_v46 }
 0x2c3   :  { %v2030_v47 = vpop.eup %2029 }
 0x2c4   :  { %v2032_v49 = vpop.eup %2031  ;;  %v791_v50 = vmul.f32 %v2030_v47, %v789_v38  ;;  %2033 = vrcp.f32 %v828_v44  ;;  %vm796_vm9 = vweird.f32 %v2030_v47  ;;  %v840_v58 = vand.u32 2147483648, %v828_v44 }
 0x2c5   :  { %v810_v51 = vmul.f32 %v2032_v49, %v808_v42  ;;  %2035 = vtanh.f32 %v784_v48  ;;  %vm815_vm10 = vweird.f32 %v2032_v49  ;;  %vm797_vm13 = vmor %vm795_vm11, %vm796_vm9  ;;  %vm834_vm3 = vweird.f32 %v828_v44 }
 0x2c6   :  { %v792_v1 = vsub.f32 1.0, %v791_v50  ;;  %vm816_vm14 = vmor %vm814_vm12, %vm815_vm10  ;;  %v838_v53 = vand.u32 2147483647, %v828_v44  ;;  %v841_v35 = vor.u32 1.1754944e-38, %v840_v58 }
 0x2c7   :  { %v811_v52 = vsub.f32 1.0, %v810_v51 }
 0x2c8   :  { %v793_v56 = vmul.f32 %v2030_v47, %v792_v1  ;;  %vm839_vm5 = vcmp.eq.f32.partialorder %v838_v53, 8.507059e+37 }
 0x2c9   :  { %v812_v59 = vmul.f32 %v2032_v49, %v811_v52 }
 0x2ca   :  { %v2034_v60 = vpop.eup %2033  ;;  %v794_v61 = vadd.f32 %v2030_v47, %v793_v56 }
 0x2cb   :  { %v813_v0 = vadd.f32 %v2032_v49, %v812_v59  ;;  %v830_v2 = vmul.f32 %v2034_v60, %v828_v44  ;;  %v2036_v9 = vpop.eup %2035  ;;  %vm835_vm2 = vweird.f32 %v2034_v60 }
 0x2cc   :  { %v798_v8 = vsel %vm797_vm13, %v2030_v47, %v794_v61  ;;  %vm836_vm4 = vmor %vm834_vm3, %vm835_vm2 }
 0x2cd   :  { %v803_v3 = vsel %vm800_vm15, %v802_v7, %v798_v8  ;;  %v817_v39 = vsel %vm816_vm14, %v2032_v49, %v813_v0  ;;  %v831_v5 = vsub.f32 1.0, %v830_v2 }
 0x2ce   :  { %v822_v11 = vsel %vm819_vm1, %v821_v6, %v817_v39  ;;  %v848_v14 = vmul.f32 %v2036_v9, %v803_v3 }
 0x2cf   :  { %v847_v15 = vmul.f32 %v845_v4, %v822_v11  ;;  %v832_v18 = vmul.f32 %v2034_v60, %v831_v5 }
 0x2d1   :  { %v2499_v19 = vadd.f32 %v848_v14, %v847_v15  ;;  %v833_v23 = vadd.f32 %v2034_v60, %v832_v18 }
 0x2d3   :  { %2037 = vtanh.f32 %v2499_v19  ;;  %v837_v28 = vsel %vm836_vm4, %v2034_v60, %v833_v23  ;;  %v999_v0 = vrot.slane %v2499_v19, 6 }
 0x2d4   :  { %v842_v37 = vsel %vm839_vm5, %v841_v35, %v837_v28  ;;  %v2121_v35 = vld [vmem:[#allocation5 + $0x60] sm:$0xff] }
 0x2d9   :  { %v2038_v36 = vpop.eup %2037 }
 0x2da   :  { %v851_v38 = vmul.f32 %v2038_v36, %v842_v37  ;;  %v2122_v36 = vld [vmem:[#allocation5 + $0x68] sm:$0xff]  ;;  %v2123_v37 = vld [vmem:[#allocation5 + $0x70] sm:$0xff] }
 0x2dc   :  { %v853_v42 = vrot.slane %v851_v38, 6  ;;  %v2504_v40 = vsel %vm1507_vm6, %v2472_v10, %v851_v38  ;;  %v2124_v38 = vld [vmem:[#allocation5 + $0x78] sm:$0xff] }
 0x2de   :  { %1917 = vmatmul.msk.f32.vlgmr.msrb.gmra.mxu0 %vm90_vm0, %v853_v42  ;;  %1918 = vmatmul.msk.f32.vlgmr.msrb.gmra.mxu1 %vm90_vm0, %v853_v42 }
 0x2df   :  { %1919 = vmatmul.msk.f32.vlgmr.msra.gmra.mxu2 %vm90_vm0, %v853_v42  ;;  %1920 = vmatmul.msk.f32.vlgmr.msra.gmra.mxu3 %vm90_vm0, %v853_v42  ;;  %v2125_v42 = vld [vmem:[#allocation5 + $0x40] sm:$0xff] }
 0x2e0   :  { %1187 = vmatpush.msrb.mxu0 %v2288_v12  ;;  %1207 = vmatpush.msrb.mxu1 %v2290_v13 }
 0x2e1   :  { %1227 = vmatpush.msra.mxu2 %v2317_v27  ;;  %1247 = vmatpush.msra.mxu3 %v2315_v26 }
 0x2e2   :  { %1188 = vmatpush.msrb.mxu0 %v2295_v16  ;;  %1208 = vmatpush.msrb.mxu1 %v2297_v17 }
 0x2e3   :  { %1228 = vmatpush.msra.mxu2 %v2323_v30  ;;  %1248 = vmatpush.msra.mxu3 %v2321_v29 }
 0x2e4   :  { %1189 = vmatpush.msrb.mxu0 %v2301_v20  ;;  %1209 = vmatpush.msrb.mxu1 %v2303_v21 }
 0x2e5   :  { %1229 = vmatpush.msra.mxu2 %v2329_v32  ;;  %1249 = vmatpush.msra.mxu3 %v2327_v31 }
 0x2e6   :  { %1190 = vmatpush.msrb.mxu0 %v2307_v24  ;;  %1210 = vmatpush.msrb.mxu1 %v2309_v25 }
 0x2e7   :  { %1230 = vmatpush.msra.mxu2 %v2341_v34  ;;  %1250 = vmatpush.msra.mxu3 %v2338_v33 }
 0x35b   :  { %v873_v12 = vpop.f32.mrf.mxu0  ;;  %v893_v13 = vpop.f32.mrf.mxu1 }
 0x35c   :  { %v936_v16 = vadd.f32 %v873_v12, %v2380_v41  ;;  %v937_v17 = vadd.f32 %v893_v13, %v2386_v45  ;;  %v2126_v12 = vld [vmem:[#allocation5 + $0x48] sm:$0xff]  ;;  %v2127_v13 = vld [vmem:[#allocation5 + $0x50] sm:$0xff] }
 0x35e   :  { %v1921_v20 = vmul.f32 -1.442695, %v936_v16  ;;  %v1922_v21 = vmul.f32 -1.442695, %v937_v17  ;;  %v2128_v16 = vld [vmem:[#allocation5 + $0x58] sm:$0xff]  ;;  %v2129_v17 = vld [vmem:[#allocation5 + $0x20] sm:$0xff] }
 0x360   :  { %2039 = vpow2.f32 %v1921_v20  ;;  %v2130_v20 = vld [vmem:[#allocation5 + $0x28] sm:$0xff] }
 0x361   :  { %2041 = vpow2.f32 %v1922_v21  ;;  %v2131_v21 = vld [vmem:[#allocation5 + $0x30] sm:$0xff] }
 0x362   :  { %v933_v26 = vpop.f32.mrf.mxu3  ;;  %v913_v32 = vpop.f32.mrf.mxu2 }
 0x363   :  { %v939_v27 = vadd.f32 %v933_v26, %v2392_v63  ;;  %v938_v43 = vadd.f32 %v913_v32, %v2390_v62  ;;  %v2132_v26 = vld [vmem:[#allocation5 + $0x38] sm:$0xff] }
 0x365   :  { %v1923_v24 = vmul.f32 -1.442695, %v939_v27  ;;  %v2133_v27 = vld [vmem:[#allocation5] sm:$0xff] }
 0x366   :  { %v2040_v29 = vpop.eup %2039 }
 0x367   :  { %v2042_v25 = vpop.eup %2041  ;;  %v943_v30 = vadd.f32 1.0, %v2040_v29  ;;  %2043 = vpow2.f32 %v1923_v24  ;;  %v2134_v24 = vld [vmem:[#allocation5 + $0x8] sm:$0xff]  ;;  %v2135_v29 = vld [vmem:[#allocation5 + $0x10] sm:$0xff] }
 0x368   :  { %v962_v31 = vadd.f32 1.0, %v2042_v25  ;;  %v2136_v25 = vld [vmem:[#allocation5 + $0x18] sm:$0xff] }
 0x369   :  { %2045 = vrcp.f32 %v943_v30  ;;  %v955_v50 = vand.u32 2147483648, %v943_v30  ;;  %v953_v52 = vand.u32 2147483647, %v943_v30  ;;  %vm949_vm11 = vweird.f32 %v943_v30 }
 0x36a   :  { %2047 = vrcp.f32 %v962_v31  ;;  %v974_v51 = vand.u32 2147483648, %v962_v31  ;;  %v972_v55 = vand.u32 2147483647, %v962_v31  ;;  %vm968_vm12 = vweird.f32 %v962_v31 }
 0x36b   :  { %v956_v59 = vor.u32 1.1754944e-38, %v955_v50  ;;  %vm954_vm15 = vcmp.eq.f32.partialorder %v953_v52, 8.507059e+37 }
 0x36c   :  { %v975_v61 = vor.u32 1.1754944e-38, %v974_v51  ;;  %vm973_vm1 = vcmp.eq.f32.partialorder %v972_v55, 8.507059e+37 }
 0x36d   :  { %v2044_v33 = vpop.eup %2043 }
 0x36e   :  { %v982_v34 = vadd.f32 1.0, %v2044_v33 }
 0x36f   :  { %v2046_v10 = vpop.eup %2045 }
 0x370   :  { %v2048_v46 = vpop.eup %2047  ;;  %v945_v44 = vmul.f32 %v2046_v10, %v943_v30  ;;  %2049 = vrcp.f32 %v982_v34  ;;  %vm950_vm9 = vweird.f32 %v2046_v10  ;;  %v994_v15 = vand.u32 2147483648, %v982_v34 }
 0x371   :  { %v964_v47 = vmul.f32 %v2048_v46, %v962_v31  ;;  %2051 = vtanh.f32 %v938_v43  ;;  %vm969_vm10 = vweird.f32 %v2048_v46  ;;  %vm951_vm13 = vmor %vm949_vm11, %vm950_vm9  ;;  %vm988_vm3 = vweird.f32 %v982_v34 }
 0x372   :  { %v946_v48 = vsub.f32 1.0, %v945_v44  ;;  %vm970_vm14 = vmor %vm968_vm12, %vm969_vm10  ;;  %v992_v18 = vand.u32 2147483647, %v982_v34  ;;  %v995_v23 = vor.u32 1.1754944e-38, %v994_v15 }
 0x373   :  { %v965_v49 = vsub.f32 1.0, %v964_v47 }
 0x374   :  { %v947_v1 = vmul.f32 %v2046_v10, %v946_v48  ;;  %vm993_vm5 = vcmp.eq.f32.partialorder %v992_v18, 8.507059e+37 }
 0x375   :  { %v966_v54 = vmul.f32 %v2048_v46, %v965_v49 }
 0x376   :  { %v2050_v56 = vpop.eup %2049  ;;  %v948_v57 = vadd.f32 %v2046_v10, %v947_v1 }
 0x377   :  { %v967_v22 = vadd.f32 %v2048_v46, %v966_v54  ;;  %v984_v60 = vmul.f32 %v2050_v56, %v982_v34  ;;  %v2052_v2 = vpop.eup %2051  ;;  %vm989_vm2 = vweird.f32 %v2050_v56 }
 0x378   :  { %v952_v7 = vsel %vm951_vm13, %v2046_v10, %v948_v57  ;;  %vm990_vm4 = vmor %vm988_vm3, %vm989_vm2 }
 0x379   :  { %v957_v4 = vsel %vm954_vm15, %v956_v59, %v952_v7  ;;  %v971_v6 = vsel %vm970_vm14, %v2048_v46, %v967_v22  ;;  %v985_v8 = vsub.f32 1.0, %v984_v60 }
 0x37a   :  { %v976_v9 = vsel %vm973_vm1, %v975_v61, %v971_v6  ;;  %v1002_v3 = vmul.f32 %v2052_v2, %v957_v4 }
 0x37b   :  { %v1001_v39 = vmul.f32 %v999_v0, %v976_v9  ;;  %v986_v5 = vmul.f32 %v2050_v56, %v985_v8 }
 0x37d   :  { %v2531_v11 = vadd.f32 %v1002_v3, %v1001_v39  ;;  %v987_v14 = vadd.f32 %v2050_v56, %v986_v5 }
 0x37f   :  { %2053 = vtanh.f32 %v2531_v11  ;;  %v991_v19 = vsel %vm990_vm4, %v2050_v56, %v987_v14 }
 0x380   :  { %v996_v53 = vsel %vm993_vm5, %v995_v23, %v991_v19  ;;  %v1164_v23 = vrot.slane %v2531_v11, 6 }
 0x385   :  { %v2054_v58 = vpop.eup %2053 }
 0x386   :  { %v2534_v28 = vmul.f32 %v2054_v58, %v996_v53 }
 0x388   :  { %1924 = vmatmul.msk.f32.vlgmr.msra.gmra.mxu0 %vm90_vm0, %v2534_v28  ;;  %1925 = vmatmul.msk.f32.vlgmr.msra.gmra.mxu1 %vm90_vm0, %v2534_v28 }
 0x389   :  { %1926 = vmatmul.msk.f32.vlgmr.msrb.gmra.mxu2 %vm90_vm0, %v2534_v28  ;;  %1927 = vmatmul.msk.f32.vlgmr.msrb.gmra.mxu3 %vm90_vm0, %v2534_v28 }
 0x38a   :  { %1353 = vmatpush.msra.mxu0 %v2121_v35  ;;  %1373 = vmatpush.msra.mxu1 %v2122_v36 }
 0x38b   :  { %1393 = vmatpush.msrb.mxu2 %v2123_v37  ;;  %1413 = vmatpush.msrb.mxu3 %v2124_v38 }
 0x38c   :  { %1354 = vmatpush.msra.mxu0 %v2125_v42  ;;  %1374 = vmatpush.msra.mxu1 %v2126_v12 }
 0x38d   :  { %1394 = vmatpush.msrb.mxu2 %v2127_v13  ;;  %1414 = vmatpush.msrb.mxu3 %v2128_v16 }
 0x38e   :  { %1355 = vmatpush.msra.mxu0 %v2129_v17  ;;  %1375 = vmatpush.msra.mxu1 %v2130_v20 }
 0x38f   :  { %1395 = vmatpush.msrb.mxu2 %v2131_v21  ;;  %1415 = vmatpush.msrb.mxu3 %v2132_v26 }
 0x390   :  { %1356 = vmatpush.msra.mxu0 %v2133_v27  ;;  %1376 = vmatpush.msra.mxu1 %v2134_v24 }
 0x391   :  { %1396 = vmatpush.msrb.mxu2 %v2135_v29  ;;  %1416 = vmatpush.msrb.mxu3 %v2136_v25 }
 0x405   :  { %v1026_v30 = vpop.f32.mrf.mxu0  ;;  %v1046_v31 = vpop.f32.mrf.mxu1 }
 0x406   :  { %v1093_v32 = vrot.slane %v1026_v30, 6  ;;  %v1094_v33 = vrot.slane %v1046_v31, 6 }
 0x408   :  { %v1101_v34 = vadd.f32 %v1093_v32, %v2380_v41  ;;  %v1102_v10 = vadd.f32 %v1094_v33, %v2386_v45 }
 0x40a   :  { %v1928_v43 = vmul.f32 -1.442695, %v1101_v34  ;;  %v1929_v46 = vmul.f32 -1.442695, %v1102_v10 }
 0x40c   :  { %2055 = vpow2.f32 %v1928_v43  ;;  %v1086_v44 = vpop.f32.mrf.mxu3  ;;  %v1066_v54 = vpop.f32.mrf.mxu2 }
 0x40d   :  { %2057 = vpow2.f32 %v1929_v46  ;;  %v1096_v47 = vrot.slane %v1086_v44, 6  ;;  %v1095_v55 = vrot.slane %v1066_v54, 6 }
 0x40f   :  { %v1104_v48 = vadd.f32 %v1096_v47, %v2392_v63  ;;  %v1103_v22 = vadd.f32 %v1095_v55, %v2390_v62 }
 0x411   :  { %v1930_v49 = vmul.f32 -1.442695, %v1104_v48 }
 0x412   :  { %v2056_v50 = vpop.eup %2055 }
 0x413   :  { %v2058_v51 = vpop.eup %2057  ;;  %v1108_v1 = vadd.f32 1.0, %v2056_v50  ;;  %2059 = vpow2.f32 %v1930_v49 }
 0x414   :  { %v1127_v52 = vadd.f32 1.0, %v2058_v51 }
 0x415   :  { %2061 = vrcp.f32 %v1108_v1  ;;  %v1120_v4 = vand.u32 2147483648, %v1108_v1  ;;  %v1118_v9 = vand.u32 2147483647, %v1108_v1  ;;  %vm1114_vm11 = vweird.f32 %v1108_v1 }
 0x416   :  { %2063 = vrcp.f32 %v1127_v52  ;;  %v1139_v6 = vand.u32 2147483648, %v1127_v52  ;;  %v1137_v39 = vand.u32 2147483647, %v1127_v52  ;;  %vm1133_vm12 = vweird.f32 %v1127_v52 }
 0x417   :  { %v1121_v15 = vor.u32 1.1754944e-38, %v1120_v4  ;;  %vm1119_vm15 = vcmp.eq.f32.partialorder %v1118_v9, 8.507059e+37 }
 0x418   :  { %v1140_v58 = vor.u32 1.1754944e-38, %v1139_v6  ;;  %vm1138_vm1 = vcmp.eq.f32.partialorder %v1137_v39, 8.507059e+37 }
 0x419   :  { %v2060_v56 = vpop.eup %2059 }
 0x41a   :  { %v1147_v57 = vadd.f32 1.0, %v2060_v56 }
 0x41b   :  { %v2062_v59 = vpop.eup %2061 }
 0x41c   :  { %v2064_v60 = vpop.eup %2063  ;;  %v1110_v61 = vmul.f32 %v2062_v59, %v1108_v1  ;;  %2065 = vrcp.f32 %v1147_v57  ;;  %vm1115_vm9 = vweird.f32 %v2062_v59  ;;  %v1159_v11 = vand.u32 2147483648, %v1147_v57 }
 0x41d   :  { %v1129_v7 = vmul.f32 %v2064_v60, %v1127_v52  ;;  %2067 = vtanh.f32 %v1103_v22  ;;  %vm1134_vm10 = vweird.f32 %v2064_v60  ;;  %vm1116_vm13 = vmor %vm1114_vm11, %vm1115_vm9  ;;  %vm1153_vm3 = vweird.f32 %v1147_v57 }
 0x41e   :  { %v1111_v0 = vsub.f32 1.0, %v1110_v61  ;;  %vm1135_vm14 = vmor %vm1133_vm12, %vm1134_vm10  ;;  %v1157_v21 = vand.u32 2147483647, %v1147_v57  ;;  %v1160_v27 = vor.u32 1.1754944e-38, %v1159_v11 }
 0x41f   :  { %v1130_v2 = vsub.f32 1.0, %v1129_v7 }
 0x420   :  { %v1112_v8 = vmul.f32 %v2062_v59, %v1111_v0  ;;  %vm1158_vm5 = vcmp.eq.f32.partialorder %v1157_v21, 8.507059e+37 }
 0x421   :  { %v1131_v3 = vmul.f32 %v2064_v60, %v1130_v2  ;;  %v1526_v2 = vld [vmem:[%s2693_s4] sm:$0xff] }
 0x422   :  { %v2066_v5 = vpop.eup %2065  ;;  %v1113_v14 = vadd.f32 %v2062_v59, %v1112_v8 }
 0x423   :  { %v1132_v18 = vadd.f32 %v2064_v60, %v1131_v3  ;;  %v1149_v19 = vmul.f32 %v2066_v5, %v1147_v57  ;;  %v2068_v35 = vpop.eup %2067  ;;  %vm1154_vm2 = vweird.f32 %v2066_v5  ;;  %v1529_v57 = vld [vmem:[%s2693_s4 + $0x18] sm:$0xff] }
 0x424   :  { %v1117_v53 = vsel %vm1116_vm13, %v2062_v59, %v1113_v14  ;;  %vm1155_vm4 = vmor %vm1153_vm3, %vm1154_vm2  ;;  %v1528_v59 = vld [vmem:[%s2693_s4 + $0x10] sm:$0xff] }
 0x425   :  { %v1122_v36 = vsel %vm1119_vm15, %v1121_v15, %v1117_v53  ;;  %v1136_v37 = vsel %vm1135_vm14, %v2064_v60, %v1132_v18  ;;  %v1150_v38 = vsub.f32 1.0, %v1149_v19  ;;  %v1527_v60 = vld [vmem:[%s2693_s4 + $0x8] sm:$0xff] }
 0x426   :  { %v1141_v42 = vsel %vm1138_vm1, %v1140_v58, %v1136_v37  ;;  %v1167_v12 = vmul.f32 %v2068_v35, %v1122_v36 }
 0x427   :  { %v1166_v13 = vmul.f32 %v1164_v23, %v1141_v42  ;;  %v1151_v16 = vmul.f32 %v2066_v5, %v1150_v38 }
 0x429   :  { %v2549_v17 = vadd.f32 %v1167_v12, %v1166_v13  ;;  %v1152_v20 = vadd.f32 %v2066_v5, %v1151_v16 }
 0x42b   :  { %2069 = vtanh.f32 %v2549_v17  ;;  %v1156_v26 = vsel %vm1155_vm4, %v2066_v5, %v1152_v20  ;;  %v1330_v37 = vrot.slane %v2549_v17, 6 }
 0x42c   :  { %v1161_v29 = vsel %vm1158_vm5, %v1160_v27, %v1156_v26 }
 0x431   :  { %v2070_v24 = vpop.eup %2069 }
 0x432   :  { %v2552_v25 = vmul.f32 %v2070_v24, %v1161_v29 }
 0x434   :  { %v1172_v30 = vrot.slane %v2552_v25, 2 }
 0x436   :  { %1931 = vmatmul.msk.f32.vlgmr.msrb.gmra.mxu0 %vm90_vm0, %v1172_v30  ;;  %1932 = vmatmul.msk.f32.vlgmr.msrb.gmra.mxu1 %vm90_vm0, %v1172_v30 }
 0x437   :  { %1933 = vmatmul.msk.f32.vlgmr.msra.gmra.mxu2 %vm90_vm0, %v1172_v30  ;;  %1934 = vmatmul.msk.f32.vlgmr.msra.gmra.mxu3 %vm90_vm0, %v1172_v30 }
 0x438   :  { %1550 = vmatpush.msrb.mxu0 %v1529_v57 }
 0x43a   :  { %1551 = vmatpush.msrb.mxu0 %v1528_v59 }
 0x43c   :  { %1552 = vmatpush.msrb.mxu0 %v1527_v60 }
 0x43e   :  { %1553 = vmatpush.msrb.mxu0 %v1526_v2 }
 0x4b3   :  { %v1192_v31 = vpop.f32.mrf.mxu0  ;;  %v1212_v32 = vpop.f32.mrf.mxu1 }
 0x4b4   :  { %v1259_v33 = vrot.slane %v1192_v31, 4  ;;  %v1260_v34 = vrot.slane %v1212_v32, 4 }
 0x4b6   :  { %v1267_v10 = vadd.f32 %v1259_v33, %v2380_v41  ;;  %v1268_v43 = vadd.f32 %v1260_v34, %v2386_v45 }
 0x4b8   :  { %v1935_v46 = vmul.f32 -1.442695, %v1267_v10  ;;  %v1936_v44 = vmul.f32 -1.442695, %v1268_v43  ;;  %v1509_v43 = vsel %vm1503_vm7, %v2534_v28, %v2552_v25  ;;  %v1563_v28 = vld [vmem:[%s2695_s6] sm:$0xff]  ;;  %vm1569_vm7 = vcmask 130048  }
 0x4ba   :  { %2071 = vpow2.f32 %v1935_v46  ;;  %v1252_v47 = vpop.f32.mrf.mxu3  ;;  %v1232_v55 = vpop.f32.mrf.mxu2 }
 0x4bb   :  { %2073 = vpow2.f32 %v1936_v44  ;;  %v1262_v48 = vrot.slane %v1252_v47, 4  ;;  %v1261_v56 = vrot.slane %v1232_v55, 4  ;;  %v1564_v47 = vld [vmem:[%s2695_s6 + $0x8] sm:$0xff]  ;;  %v2602_v55 = vld [vmem:[%s2694_s5] ss:$0 sm:$0xff] }
 0x4bc   :  { %1590 = vmatpush.msrb.mxu1 %v1564_v47 }
 0x4bd   :  { %v1270_v49 = vadd.f32 %v1262_v48, %v2392_v63  ;;  %v1269_v0 = vadd.f32 %v1261_v56, %v2390_v62 }
 0x4be   :  { %1591 = vmatpush.msrb.mxu1 %v1563_v28 }
 0x4bf   :  { %v1937_v50 = vmul.f32 -1.442695, %v1270_v49 }
 0x4c0   :  { %v2072_v51 = vpop.eup %2071 }
 0x4c1   :  { %v2074_v1 = vpop.eup %2073  ;;  %v1274_v52 = vadd.f32 1.0, %v2072_v51  ;;  %2075 = vpow2.f32 %v1937_v50 }
 0x4c2   :  { %v1293_v54 = vadd.f32 1.0, %v2074_v1 }
 0x4c3   :  { %2077 = vrcp.f32 %v1274_v52  ;;  %v1286_v39 = vand.u32 2147483648, %v1274_v52  ;;  %v1284_v15 = vand.u32 2147483647, %v1274_v52  ;;  %vm1280_vm11 = vweird.f32 %v1274_v52 }
 0x4c4   :  { %2079 = vrcp.f32 %v1293_v54  ;;  %v1305_v5 = vand.u32 2147483648, %v1293_v54  ;;  %v1303_v19 = vand.u32 2147483647, %v1293_v54  ;;  %vm1299_vm12 = vweird.f32 %v1293_v54 }
 0x4c5   :  { %v1287_v53 = vor.u32 1.1754944e-38, %v1286_v39  ;;  %vm1285_vm15 = vcmp.eq.f32.partialorder %v1284_v15, 8.507059e+37 }
 0x4c6   :  { %v1306_v38 = vor.u32 1.1754944e-38, %v1305_v5  ;;  %vm1304_vm1 = vcmp.eq.f32.partialorder %v1303_v19, 8.507059e+37 }
 0x4c7   :  { %v2076_v22 = vpop.eup %2075 }
 0x4c8   :  { %v1313_v61 = vadd.f32 1.0, %v2076_v22 }
 0x4c9   :  { %v2078_v7 = vpop.eup %2077 }
 0x4ca   :  { %v2080_v4 = vpop.eup %2079  ;;  %v1276_v6 = vmul.f32 %v2078_v7, %v1274_v52  ;;  %2081 = vrcp.f32 %v1313_v61  ;;  %vm1281_vm9 = vweird.f32 %v2078_v7  ;;  %v1325_v17 = vand.u32 2147483648, %v1313_v61 }
 0x4cb   :  { %v1295_v8 = vmul.f32 %v2080_v4, %v1293_v54  ;;  %2083 = vtanh.f32 %v1269_v0  ;;  %vm1300_vm10 = vweird.f32 %v2080_v4  ;;  %vm1282_vm13 = vmor %vm1280_vm11, %vm1281_vm9  ;;  %vm1319_vm3 = vweird.f32 %v1313_v61 }
 0x4cc   :  { %v1277_v9 = vsub.f32 1.0, %v1276_v6  ;;  %vm1301_vm14 = vmor %vm1299_vm12, %vm1300_vm10  ;;  %v1323_v30 = vand.u32 2147483647, %v1313_v61  ;;  %v1326_v32 = vor.u32 1.1754944e-38, %v1325_v17 }
 0x4cd   :  { %v1296_v3 = vsub.f32 1.0, %v1295_v8 }
 0x4ce   :  { %v1278_v14 = vmul.f32 %v2078_v7, %v1277_v9  ;;  %vm1324_vm5 = vcmp.eq.f32.partialorder %v1323_v30, 8.507059e+37 }
 0x4cf   :  { %v1297_v18 = vmul.f32 %v2080_v4, %v1296_v3 }
 0x4d0   :  { %v2082_v23 = vpop.eup %2081  ;;  %v1279_v58 = vadd.f32 %v2078_v7, %v1278_v14 }
 0x4d1   :  { %v1298_v35 = vadd.f32 %v2080_v4, %v1297_v18  ;;  %v1315_v36 = vmul.f32 %v2082_v23, %v1313_v61  ;;  %v2084_v12 = vpop.eup %2083  ;;  %vm1320_vm2 = vweird.f32 %v2082_v23 }
 0x4d2   :  { %v1283_v42 = vsel %vm1282_vm13, %v2078_v7, %v1279_v58  ;;  %vm1321_vm4 = vmor %vm1319_vm3, %vm1320_vm2 }
 0x4d3   :  { %v1288_v13 = vsel %vm1285_vm15, %v1287_v53, %v1283_v42  ;;  %v1302_v16 = vsel %vm1301_vm14, %v2080_v4, %v1298_v35  ;;  %v1316_v20 = vsub.f32 1.0, %v1315_v36 }
 0x4d4   :  { %v1307_v11 = vsel %vm1304_vm1, %v1306_v38, %v1302_v16  ;;  %v1333_v21 = vmul.f32 %v2084_v12, %v1288_v13 }
 0x4d5   :  { %v1332_v26 = vmul.f32 %v1330_v37, %v1307_v11  ;;  %v1317_v27 = vmul.f32 %v2082_v23, %v1316_v20 }
 0x4d7   :  { %v2576_v24 = vadd.f32 %v1333_v21, %v1332_v26  ;;  %v1318_v29 = vadd.f32 %v2082_v23, %v1317_v27 }
 0x4d9   :  { %2085 = vtanh.f32 %v2576_v24  ;;  %v1322_v31 = vsel %vm1321_vm4, %v2082_v23, %v1318_v29  ;;  %v1496_v13 = vrot.slane %v2576_v24, 6 }
 0x4da   :  { %v1327_v34 = vsel %vm1324_vm5, %v1326_v32, %v1322_v31  ;;  %vm1757_vm5 = vcmask 254976  }
 0x4df   :  { %v2086_v33 = vpop.eup %2085 }
 0x4e0   :  { %v1336_v10 = vmul.f32 %v2086_v33, %v1327_v34 }
 0x4e2   :  { %v1338_v46 = vrot.slane %v1336_v10, 4  ;;  %v2583_v44 = vsel %vm1505_vm8, %v1509_v43, %v1336_v10 }
 0x4e4   :  { %1938 = vmatmul.msk.f32.vlgmr.msra.gmra.mxu0 %vm90_vm0, %v1338_v46  ;;  %1939 = vmatmul.msk.f32.vlgmr.msra.gmra.mxu1 %vm90_vm0, %v1338_v46 }
 0x4e5   :  { %1940 = vmatmul.msk.f32.vlgmr.msrb.gmra.mxu2 %vm90_vm0, %v1338_v46  ;;  %1941 = vmatmul.msk.f32.vlgmr.msrb.gmra.mxu3 %vm90_vm0, %v1338_v46 }
 0x4ec   :  { %1945 = vmatmul.msk.f32.vlgmr.msrb.gmra.mxu0 %vm90_vm0, %v2504_v40 }
 0x561   :  { %v1358_v25 = vpop.f32.mrf.mxu0  ;;  %v1378_v48 = vpop.f32.mrf.mxu1 }
 0x562   :  { %v1425_v49 = vrot.slane %v1358_v25, 2  ;;  %v1426_v50 = vrot.slane %v1378_v48, 2 }
 0x564   :  { %v1433_v51 = vadd.f32 %v1425_v49, %v2380_v41  ;;  %v1434_v1 = vadd.f32 %v1426_v50, %v2386_v45 }
 0x566   :  { %v1942_v52 = vmul.f32 -1.442695, %v1433_v51  ;;  %v1943_v54 = vmul.f32 -1.442695, %v1434_v1  ;;  %v1974_v51 = vld [vmem:[%s2696_s7] ss:$0 sm:$0xff] }
 0x567   :  { %s2223_s7 = smov [#allocation7]  }
 0x568   :  { %2087 = vpow2.f32 %v1942_v52  ;;  %v1418_v56 = vpop.f32.mrf.mxu3  ;;  %v1398_v4 = vpop.f32.mrf.mxu2  ;;  %v2220_v52 = vmov 1   ;;  %s1872_s10 = sshll.u32 %s2223_s7, 4  ;;  %s1873_s10 = int_to_ptr.vmem [resolvable:$true] %s1872_s10 }
 0x569   :  { %2089 = vpow2.f32 %v1943_v54  ;;  %v1428_v57 = vrot.slane %v1418_v56, 2  ;;  %v1555_v59 = vpop.f32.mrf.mxu0  ;;  %v1427_v6 = vrot.slane %v1398_v4, 2  ;;  %1968 = vset.pattern.permute.xlu2 %v2220_v52  ;;  %1967 = vset.pattern.permute.xlu1 %v2220_v52 }
 0x56a   :  { %v1556_v22 = vadd.f32 %v2602_v55, %v1555_v59  ;;  %1966 = vset.pattern.permute.xlu0 %v2220_v52 }
 0x56b   :  { %v1436_v60 = vadd.f32 %v1428_v57, %v2392_v63  ;;  %v1435_v39 = vadd.f32 %v1427_v6, %v2390_v62 }
 0x56c   :  { %v1561_v41 = vmax.f32 %v1556_v22, 0.0 }
 0x56d   :  { %v1944_v61 = vmul.f32 -1.442695, %v1436_v60 }
 0x56e   :  { %v2088_v45 = vpop.eup %2087  ;;  %1947 = vmatmul.msk.f32.vlgmr.msrb.gmra.mxu1 %vm1569_vm7, %v1561_v41 }
 0x56f   :  { %v2090_v7 = vpop.eup %2089  ;;  %v1440_v0 = vadd.f32 1.0, %v2088_v45  ;;  %2091 = vpow2.f32 %v1944_v61 }
 0x570   :  { %v1459_v2 = vadd.f32 1.0, %v2090_v7 }
 0x571   :  { %2093 = vrcp.f32 %v1440_v0  ;;  %v1452_v19 = vand.u32 2147483648, %v1440_v0  ;;  %v1450_v53 = vand.u32 2147483647, %v1440_v0  ;;  %vm1446_vm10 = vweird.f32 %v1440_v0 }
 0x572   :  { %2095 = vrcp.f32 %v1459_v2  ;;  %v1471_v23 = vand.u32 2147483648, %v1459_v2  ;;  %v1469_v36 = vand.u32 2147483647, %v1459_v2  ;;  %vm1465_vm11 = vweird.f32 %v1459_v2 }
 0x573   :  { %v1453_v62 = vor.u32 1.1754944e-38, %v1452_v19  ;;  %vm1451_vm13 = vcmp.eq.f32.partialorder %v1450_v53, 8.507059e+37 }
 0x574   :  { %v1472_v16 = vor.u32 1.1754944e-38, %v1471_v23  ;;  %vm1470_vm15 = vcmp.eq.f32.partialorder %v1469_v36, 8.507059e+37 }
 0x575   :  { %v2092_v8 = vpop.eup %2091 }
 0x576   :  { %v1479_v9 = vadd.f32 1.0, %v2092_v8 }
 0x577   :  { %v2094_v3 = vpop.eup %2093 }
 0x578   :  { %v2096_v63 = vpop.eup %2095  ;;  %v1442_v5 = vmul.f32 %v2094_v3, %v1440_v0  ;;  %2097 = vrcp.f32 %v1479_v9  ;;  %vm1447_vm8 = vweird.f32 %v2094_v3  ;;  %v1491_v34 = vand.u32 2147483648, %v1479_v9 }
 0x579   :  { %v1461_v14 = vmul.f32 %v2096_v63, %v1459_v2  ;;  %2099 = vtanh.f32 %v1435_v39  ;;  %vm1466_vm9 = vweird.f32 %v2096_v63  ;;  %vm1448_vm12 = vmor %vm1446_vm10, %vm1447_vm8  ;;  %vm1485_vm2 = vweird.f32 %v1479_v9 }
 0x57a   :  { %v1443_v15 = vsub.f32 1.0, %v1442_v5  ;;  %vm1467_vm14 = vmor %vm1465_vm11, %vm1466_vm9  ;;  %v1489_v24 = vand.u32 2147483647, %v1479_v9  ;;  %v1492_v43 = vor.u32 1.1754944e-38, %v1491_v34 }
 0x57b   :  { %v1462_v18 = vsub.f32 1.0, %v1461_v14 }
 0x57c   :  { %v1444_v58 = vmul.f32 %v2094_v3, %v1443_v15  ;;  %vm1490_vm4 = vcmp.eq.f32.partialorder %v1489_v24, 8.507059e+37 }
 0x57d   :  { %v1463_v35 = vmul.f32 %v2096_v63, %v1462_v18 }
 0x57e   :  { %v2098_v37 = vpop.eup %2097  ;;  %v1445_v38 = vadd.f32 %v2094_v3, %v1444_v58 }
 0x57f   :  { %v1464_v42 = vadd.f32 %v2096_v63, %v1463_v35  ;;  %v1481_v12 = vmul.f32 %v2098_v37, %v1479_v9  ;;  %v2100_v11 = vpop.eup %2099  ;;  %vm1486_vm1 = vweird.f32 %v2098_v37 }
 0x580   :  { %v1449_v20 = vsel %vm1448_vm12, %v2094_v3, %v1445_v38  ;;  %vm1487_vm3 = vmor %vm1485_vm2, %vm1486_vm1 }
 0x581   :  { %v1454_v21 = vsel %vm1451_vm13, %v1453_v62, %v1449_v20  ;;  %v1468_v26 = vsel %vm1467_vm14, %v2096_v63, %v1464_v42  ;;  %v1482_v27 = vsub.f32 1.0, %v1481_v12 }
 0x582   :  { %v1473_v29 = vsel %vm1470_vm15, %v1472_v16, %v1468_v26  ;;  %v1499_v17 = vmul.f32 %v2100_v11, %v1454_v21 }
 0x583   :  { %v1498_v30 = vmul.f32 %v1496_v13, %v1473_v29  ;;  %v1483_v31 = vmul.f32 %v2098_v37, %v1482_v27 }
 0x585   :  { %v1500_v32 = vadd.f32 %v1499_v17, %v1498_v30  ;;  %v1484_v33 = vadd.f32 %v2098_v37, %v1483_v31 }
 0x587   :  { %2101 = vtanh.f32 %v1500_v32  ;;  %v1488_v10 = vsel %vm1487_vm3, %v2098_v37, %v1484_v33 }
 0x588   :  { %v1493_v47 = vsel %vm1490_vm4, %v1492_v43, %v1488_v10 }
 0x58d   :  { %v2102_v46 = vpop.eup %2101 }
 0x58e   :  { %v1502_v28 = vmul.f32 %v2102_v46, %v1493_v47 }
 0x590   :  { %v2611_v25 = vsel %vm1507_vm6, %v2583_v44, %v1502_v28  ;;  %vm1613_vm6 = vcmask 9216  }
 0x591   :  { %1946 = vmatmul.msk.f32.gmra.mxu0 %vm90_vm0, %v2611_v25 }
 0x5eb   :  { %v1593_v1 = vpop.f32.mrf.mxu1 }
 0x5ec   :  { %v1594_v44 = vadd.f32 %v1974_v51, %v1593_v1 }
 0x5ee   :  { %v1601_v54 = vrot.slane %v1594_v44, 2  ;;  %v1602_v56 = vrot.slane %v1594_v44, 4  ;;  %v1614_v45 = vsel %vm1613_vm6, %v1594_v44, -inf }
 0x5f0   :  { %v1615_v7 = vsel %vm1613_vm6, %v1601_v54, -inf  ;;  %v1616_v0 = vsel %vm1613_vm6, %v1602_v56, -inf }
 0x60e   :  { %v1558_v48 = vpop.f32.mrf.mxu0 }
 0x60f   :  { %v1559_v49 = vadd.f32 %v2602_v55, %v1558_v48  ;;  %v1603_v55 = vrot.slane %v1594_v44, 6 }
 0x611   :  { %v1562_v50 = vmax.f32 %v1559_v49, 0.0  ;;  %v1617_v2 = vsel %vm1613_vm6, %v1603_v55, -inf }
 0x613   :  { %1948 = vmatmul.msk.f32.gmra.mxu1 %vm1569_vm7, %v1562_v50  ;;  %vm1865_vm7 = vcmask 517120  }
 0x690   :  { %v1596_v57 = vpop.f32.mrf.mxu1 }
 0x691   :  { %v1597_v59 = vadd.f32 %v1974_v51, %v1596_v57 }
 0x693   :  { %v1604_v22 = vrot.slane %v1597_v59, 2  ;;  %v1605_v60 = vrot.slane %v1597_v59, 4  ;;  %v1606_v41 = vrot.slane %v1597_v59, 6  ;;  %v1618_v61 = vsel %vm1613_vm6, %v1597_v59, -inf }
 0x694   :  { %v1619_v9 = vmax.f32 %v1614_v45, %v1618_v61 }
 0x695   :  { %v1620_v4 = vsel %vm1613_vm6, %v1604_v22, -inf  ;;  %v1622_v6 = vsel %vm1613_vm6, %v1605_v60, -inf  ;;  %v1624_v8 = vsel %vm1613_vm6, %v1606_v41, -inf }
 0x696   :  { %v1621_v3 = vmax.f32 %v1615_v7, %v1620_v4  ;;  %v1623_v39 = vmax.f32 %v1616_v0, %v1622_v6  ;;  %v1625_v63 = vmax.f32 %v1617_v2, %v1624_v8  ;;  %v2221_v7 = vmov 0  }
 0x697   :  { %v2222_v4 = vmov 269488144  }
 0x698   :  { %v1626_v5 = vmax.f32 %v1619_v9, %v1621_v3  ;;  %v1627_v14 = vmax.f32 %v1623_v39, %v1625_v63  ;;  %v1683_v6 = vunpack.c.l.s4 %v2222_v4 }
 0x69a   :  { %v1628_v15 = vmax.f32 %v1626_v5, %v1627_v14  ;;  %v2640_v3 = vunpack.c.0.s8 %v1683_v6 }
 0x69c   :  { %v1629_v18 = vsub.f32 %v1594_v44, %v1628_v15  ;;  %v1630_v19 = vsub.f32 %v1601_v54, %v1628_v15  ;;  %v1631_v23 = vsub.f32 %v1602_v56, %v1628_v15  ;;  %v1632_v58 = vsub.f32 %v1603_v55, %v1628_v15 }
 0x69d   :  { %v1633_v35 = vsub.f32 %v1597_v59, %v1628_v15  ;;  %v1634_v38 = vsub.f32 %v1604_v22, %v1628_v15  ;;  %v1635_v42 = vsub.f32 %v1605_v60, %v1628_v15  ;;  %v1636_v13 = vsub.f32 %v1606_v41, %v1628_v15 }
 0x69e   :  { %v1637_v53 = vmul.f32 1.442695, %v1629_v18  ;;  %v1639_v36 = vmul.f32 1.442695, %v1630_v19  ;;  %v1641_v37 = vmul.f32 1.442695, %v1631_v23 }
 0x69f   :  { %v1643_v62 = vmul.f32 1.442695, %v1632_v58  ;;  %v1645_v12 = vmul.f32 1.442695, %v1633_v35  ;;  %v1647_v16 = vmul.f32 1.442695, %v1634_v38 }
 0x6a0   :  { %2103 = vpow2.f32 %v1637_v53  ;;  %v1649_v20 = vmul.f32 1.442695, %v1635_v42  ;;  %v1651_v26 = vmul.f32 1.442695, %v1636_v13  ;;  %v1515_v15 = vrot.slane %v2504_v40, 4 }
 0x6a1   :  { %2105 = vpow2.f32 %v1639_v36  ;;  %v1514_v23 = vrot.slane %v2504_v40, 2  ;;  %v1516_v36 = vrot.slane %v2504_v40, 6 }
 0x6a2   :  { %2107 = vpow2.f32 %v1641_v37 }
 0x6a3   :  { %2109 = vpow2.f32 %v1643_v62 }
 0x6a4   :  { %2111 = vpow2.f32 %v1645_v12 }
 0x6a5   :  { %2113 = vpow2.f32 %v1647_v16 }
 0x6a6   :  { %v2104_v11 = vpop.eup %2103  ;;  %2115 = vpow2.f32 %v1649_v20  ;;  %v1517_v20 = vrot.slane %v2611_v25, 2 }
 0x6a7   :  { %v2106_v21 = vpop.eup %2105  ;;  %v1653_v27 = vsel %vm1613_vm6, %v2104_v11, 0.0  ;;  %2117 = vpow2.f32 %v1651_v26 }
 0x6a8   :  { %v2108_v29 = vpop.eup %2107  ;;  %v1654_v17 = vsel %vm1613_vm6, %v2106_v21, 0.0 }
 0x6a9   :  { %v2110_v30 = vpop.eup %2109  ;;  %v1655_v31 = vadd.f32 %v1654_v17, %v1653_v27  ;;  %v1656_v32 = vsel %vm1613_vm6, %v2108_v29, 0.0 }
 0x6aa   :  { %v2112_v33 = vpop.eup %2111  ;;  %v1658_v24 = vsel %vm1613_vm6, %v2110_v30, 0.0 }
 0x6ab   :  { %v1657_v34 = vadd.f32 %v1656_v32, %v1655_v31  ;;  %v2114_v10 = vpop.eup %2113  ;;  %v1660_v46 = vsel %vm1613_vm6, %v2112_v33, 0.0 }
 0x6ac   :  { %v2116_v47 = vpop.eup %2115  ;;  %v1662_v48 = vsel %vm1613_vm6, %v2114_v10, 0.0 }
 0x6ad   :  { %v1659_v43 = vadd.f32 %v1658_v24, %v1657_v34  ;;  %v2118_v49 = vpop.eup %2117  ;;  %v1664_v51 = vsel %vm1613_vm6, %v2116_v47, 0.0 }
 0x6ae   :  { %v1666_v44 = vsel %vm1613_vm6, %v2118_v49, 0.0 }
 0x6af   :  { %v1661_v28 = vadd.f32 %v1660_v46, %v1659_v43 }
 0x6b1   :  { %v1663_v50 = vadd.f32 %v1662_v48, %v1661_v28 }
 0x6b3   :  { %v1665_v1 = vadd.f32 %v1664_v51, %v1663_v50 }
 0x6b5   :  { %v1667_v54 = vadd.f32 %v1666_v44, %v1665_v1 }
 0x6b7   :  { %2119 = vrcp.f32 %v1667_v54 }
 0x6bd   :  { %v2120_v56 = vpop.eup %2119 }
 0x6be   :  { %v1673_v57 = vmul.f32 %v2120_v56, %v2112_v33  ;;  %v1671_v55 = vmul.f32 %v2120_v56, %v2108_v29  ;;  %v1669_v59 = vmul.f32 %v2120_v56, %v2104_v11  ;;  %v1674_v22 = vmul.f32 %v2120_v56, %v2114_v10 }
 0x6bf   :  { %v1672_v60 = vmul.f32 %v2120_v56, %v2110_v30  ;;  %v1670_v41 = vmul.f32 %v2120_v56, %v2106_v21  ;;  %v1676_v61 = vmul.f32 %v2120_v56, %v2118_v49  ;;  %v1675_v45 = vmul.f32 %v2120_v56, %v2116_v47 }
 0x6c0   :  { %1806 = vperm.xlu2 %1968, %v1673_v57   ;;  %1790 = vperm.xlu1 %1967, %v1671_v55   ;;  %v1518_v29 = vrot.slane %v2611_v25, 4  ;;  %v1519_v10 = vrot.slane %v2611_v25, 6 }
 0x6c1   :  { %1774 = vperm.xlu0 %1966, %v1669_v59  }
 0x6c8   :  { %1814 = vperm.xlu2 %1968, %v1674_v22   ;;  %1798 = vperm.xlu1 %1967, %v1672_v60  }
 0x6c9   :  { %1782 = vperm.xlu0 %1966, %v1670_v41  }
 0x6d0   :  { %1969 = vset.pattern.permute.xlu2 %v2221_v7  ;;  %1830 = vperm.xlu1 %1967, %v1676_v61  }
 0x6d1   :  { %1822 = vperm.xlu0 %1966, %v1675_v45   ;;  %1679 = vperm.xlu2 %1969, %v1669_v59  }
 0x6d8   :  { %1971 = vset.pattern.permute.xlu1 %v2221_v7 }
 0x6d9   :  { %1970 = vset.pattern.permute.xlu0 %v2221_v7  ;;  %1697 = vperm.xlu1 %1971, %v1671_v55  }
 0x6da   :  { %1706 = vperm.xlu2 %1969, %v1672_v60   ;;  %1688 = vperm.xlu0 %1970, %v1670_v41  }
 0x6e1   :  { %1715 = vperm.xlu1 %1971, %v1673_v57  }
 0x6e2   :  { %1724 = vperm.xlu2 %1969, %v1674_v22   ;;  %1733 = vperm.xlu0 %1970, %v1675_v45  }
 0x6e9   :  { %1742 = vperm.xlu1 %1971, %v1676_v61  }
 0x6ea   :  { %1972 = vset.pattern.permute.xlu0 %v2220_v52 }
 0x71a   :  { %v1807_v0 = vpop.permute.xlu2 %1806 }
 0x71b   :  { %v1812_v53 = vperm.slane %v1807_v0, %v2640_v3 }
 0x71d   :  { %v1841_v16 = vmul.f32 %v1812_v53, %v2611_v25 }
 0x71f   :  { %v1852_v24 = vsel %vm1757_vm5, %v1841_v16, 0.0 }
 0x722   :  { %v1815_v2 = vpop.permute.xlu2 %1814 }
 0x723   :  { %v1820_v38 = vperm.slane %v1815_v2, %v2640_v3 }
 0x725   :  { %v1842_v17 = vmul.f32 %v1820_v38, %v1517_v20 }
 0x727   :  { %v1854_v47 = vsel %vm1757_vm5, %v1842_v17, 0.0 }
 0x72b   :  { %v1680_v14 = vpop.permute.xlu2 %1679 }
 0x72c   :  { %v1685_v48 = vperm.slane %v1680_v14, %v2640_v3 }
 0x72e   :  { %v1749_v57 = vmul.f32 %v1685_v48, %v2504_v40 }
 0x730   :  { %v1758_v45 = vsel %vm1757_vm5, %v1749_v57, 0.0 }
 0x732   :  { %v1791_v8 = vpop.permute.xlu1 %1790 }
 0x733   :  { %v1775_v9 = vpop.permute.xlu0 %1774  ;;  %v1796_v63 = vperm.slane %v1791_v8, %v2640_v3 }
 0x734   :  { %v1780_v39 = vperm.slane %v1775_v9, %v2640_v3  ;;  %v1707_v33 = vpop.permute.xlu2 %1706 }
 0x735   :  { %v1839_v35 = vmul.f32 %v1796_v63, %v1515_v15  ;;  %v1712_v55 = vperm.slane %v1707_v33, %v2640_v3 }
 0x736   :  { %v1837_v19 = vmul.f32 %v1780_v39, %v2504_v40 }
 0x737   :  { %v1848_v11 = vsel %vm1757_vm5, %v1839_v35, 0.0  ;;  %v1752_v7 = vmul.f32 %v1712_v55, %v1516_v36 }
 0x738   :  { %v1845_v62 = vsel %vm1757_vm5, %v1837_v19, 0.0 }
 0x739   :  { %v1763_v63 = vsel %vm1757_vm5, %v1752_v7, 0.0 }
 0x73a   :  { %v1799_v5 = vpop.permute.xlu1 %1798 }
 0x73b   :  { %v1783_v18 = vpop.permute.xlu0 %1782  ;;  %v1804_v52 = vperm.slane %v1799_v5, %v2640_v3 }
 0x73c   :  { %v1788_v58 = vperm.slane %v1783_v18, %v2640_v3  ;;  %v1725_v60 = vpop.permute.xlu2 %1724 }
 0x73d   :  { %v1840_v42 = vmul.f32 %v1804_v52, %v1516_v36  ;;  %v1730_v2 = vperm.slane %v1725_v60, %v2640_v3 }
 0x73e   :  { %v1838_v37 = vmul.f32 %v1788_v58, %v1514_v23 }
 0x73f   :  { %v1850_v30 = vsel %vm1757_vm5, %v1840_v42, 0.0  ;;  %v1754_v14 = vmul.f32 %v1730_v2, %v1517_v20 }
 0x740   :  { %v1846_v12 = vsel %vm1757_vm5, %v1838_v37, 0.0 }
 0x741   :  { %v1847_v13 = vadd.f32 %v1846_v12, %v1845_v62  ;;  %v1767_v58 = vsel %vm1757_vm5, %v1754_v14, 0.0 }
 0x742   :  { %v1831_v21 = vpop.permute.xlu1 %1830 }
 0x743   :  { %v1849_v26 = vadd.f32 %v1848_v11, %v1847_v13  ;;  %v1823_v27 = vpop.permute.xlu0 %1822  ;;  %v1836_v31 = vperm.slane %v1831_v21, %v2640_v3 }
 0x744   :  { %v1828_v32 = vperm.slane %v1823_v27, %v2640_v3 }
 0x745   :  { %v1851_v34 = vadd.f32 %v1850_v30, %v1849_v26  ;;  %v1844_v28 = vmul.f32 %v1836_v31, %v1519_v10 }
 0x746   :  { %v1843_v43 = vmul.f32 %v1828_v32, %v1518_v29 }
 0x747   :  { %v1853_v46 = vadd.f32 %v1852_v24, %v1851_v34  ;;  %v1858_v56 = vsel %vm1757_vm5, %v1844_v28, 0.0 }
 0x748   :  { %v1856_v50 = vsel %vm1757_vm5, %v1843_v43, 0.0 }
 0x749   :  { %v1855_v49 = vadd.f32 %v1854_v47, %v1853_v46 }
 0x74b   :  { %v1698_v51 = vpop.permute.xlu1 %1697  ;;  %v1857_v1 = vadd.f32 %v1856_v50, %v1855_v49 }
 0x74c   :  { %v1703_v44 = vperm.slane %v1698_v51, %v2640_v3  ;;  %v1689_v54 = vpop.permute.xlu0 %1688 }
 0x74d   :  { %v1694_v59 = vperm.slane %v1689_v54, %v2640_v3  ;;  %v1859_v22 = vadd.f32 %v1858_v56, %v1857_v1 }
 0x74e   :  { %v1751_v41 = vmul.f32 %v1703_v44, %v1515_v15 }
 0x74f   :  { %v1750_v61 = vmul.f32 %v1694_v59, %v1514_v23  ;;  %1861 = vrot.lane.b32.xlu2 %v1859_v22, %s2217_s14 }
 0x750   :  { %v1761_v40 = vsel %vm1757_vm5, %v1751_v41, 0.0 }
 0x751   :  { %v1759_v0 = vsel %vm1757_vm5, %v1750_v61, 0.0 }
 0x752   :  { %v1760_v4 = vadd.f32 %v1759_v0, %v1758_v45 }
 0x753   :  { %v1716_v6 = vpop.permute.xlu1 %1715 }
 0x754   :  { %v1762_v8 = vadd.f32 %v1761_v40, %v1760_v4  ;;  %v1721_v9 = vperm.slane %v1716_v6, %v2640_v3  ;;  %v1734_v39 = vpop.permute.xlu0 %1733 }
 0x755   :  { %v1739_v5 = vperm.slane %v1734_v39, %v2640_v3 }
 0x756   :  { %v1753_v15 = vmul.f32 %v1721_v9, %v2611_v25  ;;  %v1764_v18 = vadd.f32 %v1763_v63, %v1762_v8 }
 0x757   :  { %v1755_v52 = vmul.f32 %v1739_v5, %v1518_v29 }
 0x758   :  { %v1765_v19 = vsel %vm1757_vm5, %v1753_v15, 0.0 }
 0x759   :  { %v1766_v23 = vadd.f32 %v1765_v19, %v1764_v18  ;;  %v1769_v36 = vsel %vm1757_vm5, %v1755_v52, 0.0 }
 0x75b   :  { %v1768_v53 = vadd.f32 %v1767_v58, %v1766_v23  ;;  %v1743_v35 = vpop.permute.xlu1 %1742 }
 0x75c   :  { %v1748_v37 = vperm.slane %v1743_v35, %v2640_v3 }
 0x75d   :  { %v1770_v38 = vadd.f32 %v1769_v36, %v1768_v53 }
 0x75e   :  { %v1756_v62 = vmul.f32 %v1748_v37, %v1519_v10 }
 0x760   :  { %v1771_v42 = vsel %vm1757_vm5, %v1756_v62, 0.0 }
 0x761   :  { %v1772_v12 = vadd.f32 %v1771_v42, %v1770_v38 }
 0x7a9   :  { %v1862_v25 = vpop.permute.xlu2 %1861 }
 0x7aa   :  { %v1864_v13 = vsel %vm90_vm0, %v1772_v12, %v1862_v25 }
 0x7ab   :  { %1866 = vst.msk [vmem:[#allocation7] sm:$0x3] %vm1865_vm7, %v1864_v13 }
 0x7ac   :  { %1877 = dma.vmem_to_hbm [thread:$0]  %s1873_s10, 32, %s1875_s13, [#allocation4]  }
 0x7ad   :  { %2213 = dma.done.wait [#allocation4], 32  }
 0x7ae   :  { %2214 = vsyncadd [#allocation4], 4294967264 }
 0x7af   :  { %1882 = vsyncpa [#allocation3], 1 }
 0x7b0   :  { %1883 = vsyncpa [#allocation6], 1 }
 0x7b1   :  { %1884 = vsyncpa [#allocation4], 1 }

</bundles_post_ra>
